<compile_context>
chip_gen: v7x
topology: tpu7x:2x2x1
jax: 0.10.0
libtpu: 0.0.40
codegen_flags: <defaults>
</compile_context>

<pallas_src>
from functools import partial

import jax
import jax.numpy as jnp
from jax import lax
from jax.experimental import pallas as pl
from jax.experimental.pallas import tpu as pltpu


# ----------------------------- Pallas kernel --------------------------------
def crs_conv_kernel(q_ref, kv_ref,
                    wq_ref, bq_ref, wkv_ref, bkv_ref,
                    wo_ref, bo_ref,
                    ln_g_ref, ln_b_ref,
                    w1a_ref, b1a_ref, w1b_ref, b1b_ref,
                    w2_ref, b2_ref,
                    w3a_ref, b3a_ref, w3b_ref, b3b_ref,
                    w4_ref, b4_ref,
                    out_ref, pr_ref,
                    *, Sq, Sk):
    f32 = jnp.float32
    bf16 = jnp.bfloat16

    R, H = q_ref.shape            # R  = TB * Sq
    Rk = kv_ref.shape[0]          # Rk = TB * Sk
    TB = R // Sq

    j = pl.program_id(1)          # Dout tile index

    # Everything up to `pr` depends only on the batch tile -> compute once per
    # batch tile (j == 0) and cache it in VMEM for the remaining Dout tiles.
    @pl.when(j == 0)
    def _compute_pr():
        q = q_ref[...]                                    # (R, H)  f32
        qb = q.astype(bf16)
        kvb = kv_ref[...].astype(bf16)                    # (Rk, H)

        # --- attention projections (bf16 MXU, f32 acc); K/V fused (N = 2H) ---
        qp = jnp.dot(qb, wq_ref[...], preferred_element_type=f32) + bq_ref[...]
        kvp = jnp.dot(kvb, wkv_ref[...],
                      preferred_element_type=f32) + bkv_ref[...]
        kp = kvp[:, :H]
        vp = kvp[:, H:]

        # --- single dense score matmul + block-diagonal batch mask ---------
        scale = 1.0 / jnp.sqrt(f32(H))
        scores = lax.dot_general(
            qp.astype(bf16), kp.astype(bf16),
            dimension_numbers=(((1,), (1,)), ((), ())),
            preferred_element_type=f32) * scale           # (R, Rk)
        if TB > 1:
            row_blk = lax.broadcasted_iota(jnp.int32, (R, Rk), 0) // Sq
            col_blk = lax.broadcasted_iota(jnp.int32, (R, Rk), 1) // Sk
            scores = jnp.where(row_blk == col_blk, scores, f32(-1e30))

        scores = scores - jnp.max(scores, axis=-1, keepdims=True)
        probs = jnp.exp(scores)                           # f32 softmax math
        denom = jnp.sum(probs, axis=-1, keepdims=True)
        probs = probs * pl.reciprocal(denom, approx=True)   # EUP slot

        attn = jnp.dot(probs.astype(bf16), vp.astype(bf16),
                       preferred_element_type=f32)        # (R, H)
        attn = jnp.dot(attn.astype(bf16), wo_ref[...],
                       preferred_element_type=f32) + bo_ref[...]

        # --- residual + LayerNorm (f32 elementwise, eps=1e-5) ---------------
        x = q + attn
        mu = jnp.mean(x, axis=-1, keepdims=True)
        var = jnp.mean((x - mu) * (x - mu), axis=-1, keepdims=True)
        x = (x - mu) * lax.rsqrt(var + 1e-5) * ln_g_ref[...] + ln_b_ref[...]

        # --- conv_token_proj1 (H -> H/2 -> H, ReLU) + residual ---------------
        h1 = jnp.maximum(jnp.dot(x.astype(bf16), w1a_ref[...],
                                 preferred_element_type=f32) + b1a_ref[...], 0.0)
        tok = jnp.dot(h1.astype(bf16), w1b_ref[...],
                      preferred_element_type=f32) + b1b_ref[...] + x

        # --- conv_token_proj2 (H -> Ch) --------------------------------------
        tok = jnp.dot(tok.astype(bf16), w2_ref[...],
                      preferred_element_type=f32) + b2_ref[...]

        # --- conv_prompt_proj1 (Ch -> Ch/2 -> Ch, ReLU) + residual -----------
        h3 = jnp.maximum(jnp.dot(tok.astype(bf16), w3a_ref[...],
                                 preferred_element_type=f32) + b3a_ref[...], 0.0)
        pr = jnp.dot(h3.astype(bf16), w3b_ref[...],
                     preferred_element_type=f32) + b3b_ref[...] + tok

        pr_ref[...] = pr                                  # f32 cache

    # --- conv_prompt_proj2: one (>=128-wide) Dout tile per j step -------------
    out = jnp.dot(pr_ref[...].astype(bf16), w4_ref[...],
                  preferred_element_type=f32) + b4_ref[...]
    out_ref[...] = out.astype(out_ref.dtype)


# ------------------------------ helpers --------------------------------------
def _round_up(x, m):
    return -(-x // m) * m


def _pad_axis(a, axis, mult):
    pad = (-a.shape[axis]) % mult
    if pad == 0:
        return a
    widths = [(0, 0)] * a.ndim
    widths[axis] = (0, pad)
    return jnp.pad(a, widths)


def _pick_batch_tile(B, Sq, Sk):
    # smallest TB keeping f32 (8,128) sublane alignment for q and kv row blocks
    tb_unit = 1
    while (tb_unit * Sq) % 8 != 0 or (tb_unit * Sk) % 8 != 0:
        tb_unit += 1
    tb_cap = max(tb_unit, _round_up(pl.cdiv(128, Sq), tb_unit))  # ~128 q rows
    n_tiles = pl.cdiv(B, tb_cap)
    TB = min(_round_up(pl.cdiv(B, n_tiles), tb_unit), tb_cap)
    # prefer >= 2 steps on the "parallel" axis (both v7x TCs) when B allows it
    if pl.cdiv(B, TB) < 2 and B >= 2 * tb_unit:
        TB = _round_up(pl.cdiv(B, 2), tb_unit)
    return TB


def _pick_dout_tile(Ch, Dout, budget_bytes=8 << 20):
    # widest multiple-of-128 divisor of Dout whose bf16 w4 tile fits the budget
    best = 128
    for cand in range(128, Dout + 1, 128):
        if Dout % cand == 0 and Ch * cand * 2 <= budget_bytes:
            best = cand
    return best


def _vmem_limit_bytes():
    try:
        cap = int(pltpu.get_tpu_info().vmem_capacity_bytes)
    except Exception:
        cap = 64 * 1024 * 1024           # conservative fallback (v7x-safe)
    return int(min(100 * 1024 * 1024, cap * 3 // 4))


# ------------------------------ wrapper --------------------------------------
def crs_faiss_aug_conversation(last_hidden_states, faiss_aug_representation,
                               params, *, conv_num_layers, conv_num_blocks,
                               conv_num_heads, batch_tile=None):
    B, Sq, H = last_hidden_states.shape
    _, Sk, _ = faiss_aug_representation.shape
    Ch = params["w2_t"].shape[1]
    Dout = params["w4_t"].shape[1]
    J = conv_num_layers * conv_num_blocks
    assert Dout == J * Ch
    assert H % 128 == 0 and Ch % 128 == 0 and Dout % 128 == 0
    head_dim = Ch // conv_num_heads

    if batch_tile is None:
        TB = _pick_batch_tile(B, Sq, Sk)
    else:
        TB = int(batch_tile)
        assert TB >= 1 and (TB * Sq) % 8 == 0 and (TB * Sk) % 8 == 0, \
            "batch_tile must keep (8,128) f32 block alignment"
    NBT = pl.cdiv(B, TB)
    Bpad = NBT * TB
    if Bpad != B:
        pad = Bpad - B
        last_hidden_states = jnp.pad(last_hidden_states,
                                     ((0, pad), (0, 0), (0, 0)))
        faiss_aug_representation = jnp.pad(faiss_aug_representation,
                                           ((0, pad), (0, 0), (0, 0)))

    TD = _pick_dout_tile(Ch, Dout)       # w4 Dout tile width (collapses J here)
    ND = Dout // TD

    f32, bf16 = jnp.float32, jnp.bfloat16

    # flatten (B, S, H) -> (B*S, H): metadata-only; kernel sees TB*S rows/step.
    q2 = last_hidden_states.astype(f32).reshape(Bpad * Sq, H)
    kv2 = faiss_aug_representation.astype(f32).reshape(Bpad * Sk, H)

    # bf16 MXU weights; fuse K/V; pad H/2 and Ch/2 widths up to 128.
    wq = params["wq_t"].astype(bf16)
    wkv = jnp.concatenate([params["wk_t"], params["wv_t"]], axis=1).astype(bf16)
    bkv = jnp.concatenate([params["bk"], params["bv"]], axis=1).astype(f32)
    wo = params["wo_t"].astype(bf16)
    w1a = _pad_axis(params["w1a_t"], 1, 128).astype(bf16)
    b1a = _pad_axis(params["b1a"], 1, 128).astype(f32)
    w1b = _pad_axis(params["w1b_t"], 0, 128).astype(bf16)
    w2 = params["w2_t"].astype(bf16)
    w3a = _pad_axis(params["w3a_t"], 1, 128).astype(bf16)
    b3a = _pad_axis(params["b3a"], 1, 128).astype(f32)
    w3b = _pad_axis(params["w3b_t"], 0, 128).astype(bf16)
    w4 = params["w4_t"].astype(bf16)
    b4 = params["b4"].astype(f32)

    const_weights = [
        wq, params["bq"].astype(f32),
        wkv, bkv,
        wo, params["bo"].astype(f32),
        params["ln_g"].astype(f32), params["ln_b"].astype(f32),
        w1a, b1a, w1b, params["b1b"].astype(f32),
        w2, params["b2"].astype(f32),
        w3a, b3a, w3b, params["b3b"].astype(f32),
    ]

    def full_spec(shape):
        nd = len(shape)
        return pl.BlockSpec(shape, lambda bt, j, _nd=nd: (0,) * _nd)

    in_specs = [
        pl.BlockSpec((TB * Sq, H), lambda bt, j: (bt, 0)),   # q rows
        pl.BlockSpec((TB * Sk, H), lambda bt, j: (bt, 0)),   # kv rows
    ]
    in_specs += [full_spec(w.shape) for w in const_weights]
    in_specs += [
        pl.BlockSpec((Ch, TD), lambda bt, j: (0, j)),        # w4 Dout tile
        pl.BlockSpec((1, TD), lambda bt, j: (0, j)),         # b4 Dout tile
    ]
    # flat, lane-dense output: last dim TD >= 128 (multiple of 128)
    out_spec = pl.BlockSpec((TB * Sq, TD), lambda bt, j: (bt, j))

    kernel = partial(crs_conv_kernel, Sq=Sq, Sk=Sk)

    out = pl.pallas_call(
        kernel,
        out_shape=jax.ShapeDtypeStruct((Bpad * Sq, Dout), jnp.float32),
        grid_spec=pltpu.PrefetchScalarGridSpec(
            num_scalar_prefetch=0,
            grid=(NBT, ND),                   # batch tiles x Dout tiles
            in_specs=in_specs,
            out_specs=out_spec,
            scratch_shapes=[pltpu.VMEM((TB * Sq, Ch), jnp.float32)],  # cached pr
        ),
        compiler_params=pltpu.CompilerParams(
            dimension_semantics=("parallel", "arbitrary"),
            vmem_limit_bytes=_vmem_limit_bytes(),
        ),
    )(q2, kv2, *const_weights, w4, b4)

    # Same final reshape/permute as the PyTorch module (small JAX glue).
    out = out.reshape(Bpad, Sq, Dout)[:B]
    out = out.reshape(B, Sq, conv_num_layers, conv_num_blocks,
                      conv_num_heads, head_dim)
    return jnp.transpose(out, (2, 3, 0, 4, 1, 5))


# ------------------------- pure-JAX reference --------------------------------
def reference(last_hidden_states, faiss_aug_representation, p,
              conv_num_layers, conv_num_blocks, conv_num_heads):
    q, kv = last_hidden_states, faiss_aug_representation
    H = q.shape[-1]
    qp = q @ p["wq_t"] + p["bq"]
    kp = kv @ p["wk_t"] + p["bk"]
    vp = kv @ p["wv_t"] + p["bv"]
    scores = jnp.einsum("bqh,bkh->bqk", qp, kp) / jnp.sqrt(jnp.float32(H))
    probs = jax.nn.softmax(scores, axis=-1)
    attn = jnp.einsum("bqk,bkh->bqh", probs, vp) @ p["wo_t"] + p["bo"]
    x = q + attn
    mu = jnp.mean(x, axis=-1, keepdims=True)
    var = jnp.mean((x - mu) ** 2, axis=-1, keepdims=True)
    x = (x - mu) * jax.lax.rsqrt(var + 1e-5) * p["ln_g"] + p["ln_b"]
    tok = jnp.maximum(x @ p["w1a_t"] + p["b1a"], 0) @ p["w1b_t"] + p["b1b"] + x
    tok = tok @ p["w2_t"] + p["b2"]
    pr = jnp.maximum(tok @ p["w3a_t"] + p["b3a"], 0) @ p["w3b_t"] + p["b3b"] + tok
    out = pr @ p["w4_t"] + p["b4"]
    B, Sq = out.shape[0], out.shape[1]
    Ch = p["w2_t"].shape[1]
    head_dim = Ch // conv_num_heads
    out = out.reshape(B, Sq, conv_num_layers, conv_num_blocks,
                      conv_num_heads, head_dim)
    return jnp.transpose(out, (2, 3, 0, 4, 1, 5))


# ------------------------------ main ------------------------------------------
if __name__ == "__main__":
    # small shapes consistent with the module
    B, Sq, Sk = 2, 8, 8
    H = 128                    # backbone_model.config.hidden_size
    Ch = 128                   # opt['conv']['hidden_size']
    L, Bk, nH = 2, 2, 2        # conv_num_layers / num_blocks / num_heads
    Dout = L * Bk * Ch

    key = jax.random.PRNGKey(0)
    keys = jax.random.split(key, 32)
    ki = iter(range(32))

    def w(shape, scale=0.05):
        return (scale * jax.random.normal(keys[next(ki)], shape)).astype(jnp.float32)

    params = {
        # MultiheadAttention (faiss_aug_conv): in_proj split into q/k/v, out_proj
        "wq_t": w((H, H)), "bq": w((1, H)),
        "wk_t": w((H, H)), "bk": w((1, H)),
        "wv_t": w((H, H)), "bv": w((1, H)),
        "wo_t": w((H, H)), "bo": w((1, H)),
        # LayerNorm
        "ln_g": jnp.ones((1, H), jnp.float32),
        "ln_b": jnp.zeros((1, H), jnp.float32),
        # conv_token_proj1: H -> H/2 -> H
        "w1a_t": w((H, H // 2)), "b1a": w((1, H // 2)),
        "w1b_t": w((H // 2, H)), "b1b": w((1, H)),
        # conv_token_proj2: H -> Ch
        "w2_t": w((H, Ch)), "b2": w((1, Ch)),
        # conv_prompt_proj1: Ch -> Ch/2 -> Ch
        "w3a_t": w((Ch, Ch // 2)), "b3a": w((1, Ch // 2)),
        # conv_prompt_proj2: Ch -> L*Bk*Ch
        "w3b_t": w((Ch // 2, Ch)), "b3b": w((1, Ch)),
        "w4_t": w((Ch, Dout)), "b4": w((1, Dout)),
    }

    last_hidden_states = jax.random.normal(keys[next(ki)], (B, Sq, H), jnp.float32)
    faiss_aug_representation = jax.random.normal(keys[next(ki)], (B, Sk, H), jnp.float32)

    ref = reference(last_hidden_states, faiss_aug_representation, params, L, Bk, nH)

    # default tiling: TB=1, NBT=2 (no batch padding, 2 parallel steps)
    out = crs_faiss_aug_conversation(
        last_hidden_states, faiss_aug_representation, params,
        conv_num_layers=L, conv_num_blocks=Bk, conv_num_heads=nH)
    out = jax.block_until_ready(out)
    assert out.shape == (L, Bk, B, nH, Sq, Ch // nH), out.shape
    # bf16 MXU operands (f32 accumulation) -> relaxed tolerance vs f32 reference
    assert jnp.allclose(out, ref, atol=5e-2, rtol=5e-2), "mismatch (TB=1)"

    # also exercise the dense block-diag-masked attention path (TB=2, NBT=1)
    out2 = crs_faiss_aug_conversation(
        last_hidden_states, faiss_aug_representation, params,
        conv_num_layers=L, conv_num_blocks=Bk, conv_num_heads=nH, batch_tile=2)
    out2 = jax.block_until_ready(out2)
    assert jnp.allclose(out2, ref, atol=5e-2, rtol=5e-2), "mismatch (TB=2)"

    # TODO(synk): modes 'query_representation' / 'pretrain' / the knowledge-prompt
    # path require an external backbone transformer; not reproducible in-kernel.
    print("KERNEL_OK")
</pallas_src>

<mosaic_0001>
module attributes {stable_mosaic.version = 11 : i64} {
  func.func @crs_conv_kernel(%arg0: i32, %arg1: i32, %arg2: memref<8x128xf32, #tpu.memory_space<vmem>>, %arg3: memref<8x128xf32, #tpu.memory_space<vmem>>, %arg4: memref<128x128xbf16, #tpu.memory_space<vmem>>, %arg5: memref<1x128xf32, #tpu.memory_space<vmem>>, %arg6: memref<128x256xbf16, #tpu.memory_space<vmem>>, %arg7: memref<1x256xf32, #tpu.memory_space<vmem>>, %arg8: memref<128x128xbf16, #tpu.memory_space<vmem>>, %arg9: memref<1x128xf32, #tpu.memory_space<vmem>>, %arg10: memref<1x128xf32, #tpu.memory_space<vmem>>, %arg11: memref<1x128xf32, #tpu.memory_space<vmem>>, %arg12: memref<128x128xbf16, #tpu.memory_space<vmem>>, %arg13: memref<1x128xf32, #tpu.memory_space<vmem>>, %arg14: memref<128x128xbf16, #tpu.memory_space<vmem>>, %arg15: memref<1x128xf32, #tpu.memory_space<vmem>>, %arg16: memref<128x128xbf16, #tpu.memory_space<vmem>>, %arg17: memref<1x128xf32, #tpu.memory_space<vmem>>, %arg18: memref<128x128xbf16, #tpu.memory_space<vmem>>, %arg19: memref<1x128xf32, #tpu.memory_space<vmem>>, %arg20: memref<128x128xbf16, #tpu.memory_space<vmem>>, %arg21: memref<1x128xf32, #tpu.memory_space<vmem>>, %arg22: memref<128x512xbf16, #tpu.memory_space<vmem>>, %arg23: memref<1x512xf32, #tpu.memory_space<vmem>>, %arg24: memref<8x512xf32, #tpu.memory_space<vmem>>, %arg25: memref<8x128xf32, #tpu.memory_space<vmem>>) attributes {dimension_semantics = [#tpu.dimension_semantics<parallel>, #tpu.dimension_semantics<arbitrary>], iteration_bounds = array<i64: 2, 1>, scalar_prefetch = 0 : i64, scratch_operands = 1 : i64, tpu.core_type = #tpu.core_type<tc>, window_params = [{transform_indices = @transform_0, window_bounds = array<i64: 8, 128>}, {transform_indices = @transform_1, window_bounds = array<i64: 8, 128>}, {pipeline_mode = #tpu.pipeline_mode<synchronous>, transform_indices = @transform_2, window_bounds = array<i64: 128, 128>}, {pipeline_mode = #tpu.pipeline_mode<synchronous>, transform_indices = @transform_3, window_bounds = array<i64: 1, 128>}, {pipeline_mode = #tpu.pipeline_mode<synchronous>, transform_indices = @transform_4, window_bounds = array<i64: 128, 256>}, {pipeline_mode = #tpu.pipeline_mode<synchronous>, transform_indices = @transform_5, window_bounds = array<i64: 1, 256>}, {pipeline_mode = #tpu.pipeline_mode<synchronous>, transform_indices = @transform_6, window_bounds = array<i64: 128, 128>}, {pipeline_mode = #tpu.pipeline_mode<synchronous>, transform_indices = @transform_7, window_bounds = array<i64: 1, 128>}, {pipeline_mode = #tpu.pipeline_mode<synchronous>, transform_indices = @transform_8, window_bounds = array<i64: 1, 128>}, {pipeline_mode = #tpu.pipeline_mode<synchronous>, transform_indices = @transform_9, window_bounds = array<i64: 1, 128>}, {pipeline_mode = #tpu.pipeline_mode<synchronous>, transform_indices = @transform_10, window_bounds = array<i64: 128, 128>}, {pipeline_mode = #tpu.pipeline_mode<synchronous>, transform_indices = @transform_11, window_bounds = array<i64: 1, 128>}, {pipeline_mode = #tpu.pipeline_mode<synchronous>, transform_indices = @transform_12, window_bounds = array<i64: 128, 128>}, {pipeline_mode = #tpu.pipeline_mode<synchronous>, transform_indices = @transform_13, window_bounds = array<i64: 1, 128>}, {pipeline_mode = #tpu.pipeline_mode<synchronous>, transform_indices = @transform_14, window_bounds = array<i64: 128, 128>}, {pipeline_mode = #tpu.pipeline_mode<synchronous>, transform_indices = @transform_15, window_bounds = array<i64: 1, 128>}, {pipeline_mode = #tpu.pipeline_mode<synchronous>, transform_indices = @transform_16, window_bounds = array<i64: 128, 128>}, {pipeline_mode = #tpu.pipeline_mode<synchronous>, transform_indices = @transform_17, window_bounds = array<i64: 1, 128>}, {pipeline_mode = #tpu.pipeline_mode<synchronous>, transform_indices = @transform_18, window_bounds = array<i64: 128, 128>}, {pipeline_mode = #tpu.pipeline_mode<synchronous>, transform_indices = @transform_19, window_bounds = array<i64: 1, 128>}, {transform_indices = @transform_20, window_bounds = array<i64: 128, 512>}, {transform_indices = @transform_21, window_bounds = array<i64: 1, 512>}, {transform_indices = @transform_22, window_bounds = array<i64: 8, 512>}]} {
    %c0_i32 = arith.constant 0 : i32
    %0 = arith.cmpi eq, %arg1, %c0_i32 : i32
    %1 = arith.extui %0 : i1 to i32
    %c0_i32_0 = arith.constant 0 : i32
    %2 = arith.cmpi ne, %1, %c0_i32_0 : i32
    scf.if %2 {
      %c0_8 = arith.constant 0 : index
      %c0_9 = arith.constant 0 : index
      %11 = vector.load %arg2[%c0_8, %c0_9] : memref<8x128xf32, #tpu.memory_space<vmem>>, vector<8x128xf32>
      %12 = arith.truncf %11 : vector<8x128xf32> to vector<8x128xbf16>
      %c0_10 = arith.constant 0 : index
      %c0_11 = arith.constant 0 : index
      %13 = vector.load %arg3[%c0_10, %c0_11] : memref<8x128xf32, #tpu.memory_space<vmem>>, vector<8x128xf32>
      %14 = arith.truncf %13 : vector<8x128xf32> to vector<8x128xbf16>
      %c0_12 = arith.constant 0 : index
      %c0_13 = arith.constant 0 : index
      %15 = vector.load %arg4[%c0_12, %c0_13] : memref<128x128xbf16, #tpu.memory_space<vmem>>, vector<128x128xbf16>
      %cst_14 = arith.constant dense<0.000000e+00> : vector<8x128xf32>
      %16 = tpu.matmul %12, %15, %cst_14 {dimension_numbers = #tpu.dot_dimension_numbers<[1], [0], [0], [1], [0, 0, 1, 1], [], []>} : vector<8x128xbf16>, vector<128x128xbf16>, vector<8x128xf32> -> vector<8x128xf32>
      %c0_15 = arith.constant 0 : index
      %c0_16 = arith.constant 0 : index
      %17 = vector.load %arg5[%c0_15, %c0_16] : memref<1x128xf32, #tpu.memory_space<vmem>>, vector<1x128xf32>
      %18 = vector.broadcast %17 : vector<1x128xf32> to vector<8x128xf32>
      %19 = arith.addf %16, %18 : vector<8x128xf32>
      %c0_17 = arith.constant 0 : index
      %c0_18 = arith.constant 0 : index
      %20 = vector.load %arg6[%c0_17, %c0_18] : memref<128x256xbf16, #tpu.memory_space<vmem>>, vector<128x256xbf16>
      %cst_19 = arith.constant dense<0.000000e+00> : vector<8x256xf32>
      %21 = tpu.matmul %14, %20, %cst_19 {dimension_numbers = #tpu.dot_dimension_numbers<[1], [0], [0], [1], [0, 0, 1, 1], [], []>} : vector<8x128xbf16>, vector<128x256xbf16>, vector<8x256xf32> -> vector<8x256xf32>
      %c0_20 = arith.constant 0 : index
      %c0_21 = arith.constant 0 : index
      %22 = vector.load %arg7[%c0_20, %c0_21] : memref<1x256xf32, #tpu.memory_space<vmem>>, vector<1x256xf32>
      %23 = vector.broadcast %22 : vector<1x256xf32> to vector<8x256xf32>
      %24 = arith.addf %21, %23 : vector<8x256xf32>
      %25 = vector.extract_strided_slice %24 {offsets = [0, 0], sizes = [8, 128], strides = [1, 1]} : vector<8x256xf32> to vector<8x128xf32>
      %26 = vector.extract_strided_slice %24 {offsets = [0, 128], sizes = [8, 128], strides = [1, 1]} : vector<8x256xf32> to vector<8x128xf32>
      %cst_22 = arith.constant 1.280000e+02 : f32
      %27 = math.sqrt %cst_22 : f32
      %cst_23 = arith.constant 1.000000e+00 : f32
      %28 = arith.divf %cst_23, %27 : f32
      %29 = arith.truncf %19 : vector<8x128xf32> to vector<8x128xbf16>
      %30 = arith.truncf %25 : vector<8x128xf32> to vector<8x128xbf16>
      %cst_24 = arith.constant dense<0.000000e+00> : vector<8x8xf32>
      %31 = tpu.matmul %29, %30, %cst_24 {dimension_numbers = #tpu.dot_dimension_numbers<[1], [1], [0], [0], [0, 0, 1, 0], [], []>} : vector<8x128xbf16>, vector<8x128xbf16>, vector<8x8xf32> -> vector<8x8xf32>
      %32 = vector.broadcast %28 : f32 to vector<8x8xf32>
      %33 = arith.mulf %31, %32 : vector<8x8xf32>
      %cst_25 = arith.constant dense<0xFF800000> : vector<8xf32>
      %34 = vector.multi_reduction <maximumf>, %33, %cst_25 [1] : vector<8x8xf32> to vector<8xf32>
      %35 = vector.shape_cast %34 : vector<8xf32> to vector<8x1xf32>
      %36 = vector.broadcast %35 : vector<8x1xf32> to vector<8x8xf32>
      %37 = arith.subf %33, %36 : vector<8x8xf32>
      %38 = math.exp %37 : vector<8x8xf32>
      %cst_26 = arith.constant dense<0.000000e+00> : vector<8xf32>
      %39 = vector.multi_reduction <add>, %38, %cst_26 [1] : vector<8x8xf32> to vector<8xf32>
      %40 = vector.shape_cast %39 : vector<8xf32> to vector<8x1xf32>
      %41 = tpu.reciprocal %40 {approx = true} : vector<8x1xf32> -> vector<8x1xf32>
      %42 = vector.broadcast %41 : vector<8x1xf32> to vector<8x8xf32>
      %43 = arith.mulf %38, %42 : vector<8x8xf32>
      %44 = arith.truncf %43 : vector<8x8xf32> to vector<8x8xbf16>
      %45 = arith.truncf %26 : vector<8x128xf32> to vector<8x128xbf16>
      %cst_27 = arith.constant dense<0.000000e+00> : vector<8x128xf32>
      %46 = tpu.matmul %44, %45, %cst_27 {dimension_numbers = #tpu.dot_dimension_numbers<[1], [0], [0], [1], [0, 0, 1, 1], [], []>} : vector<8x8xbf16>, vector<8x128xbf16>, vector<8x128xf32> -> vector<8x128xf32>
      %47 = arith.truncf %46 : vector<8x128xf32> to vector<8x128xbf16>
      %c0_28 = arith.constant 0 : index
      %c0_29 = arith.constant 0 : index
      %48 = vector.load %arg8[%c0_28, %c0_29] : memref<128x128xbf16, #tpu.memory_space<vmem>>, vector<128x128xbf16>
      %cst_30 = arith.constant dense<0.000000e+00> : vector<8x128xf32>
      %49 = tpu.matmul %47, %48, %cst_30 {dimension_numbers = #tpu.dot_dimension_numbers<[1], [0], [0], [1], [0, 0, 1, 1], [], []>} : vector<8x128xbf16>, vector<128x128xbf16>, vector<8x128xf32> -> vector<8x128xf32>
      %c0_31 = arith.constant 0 : index
      %c0_32 = arith.constant 0 : index
      %50 = vector.load %arg9[%c0_31, %c0_32] : memref<1x128xf32, #tpu.memory_space<vmem>>, vector<1x128xf32>
      %51 = vector.broadcast %50 : vector<1x128xf32> to vector<8x128xf32>
      %52 = arith.addf %49, %51 : vector<8x128xf32>
      %53 = arith.addf %11, %52 : vector<8x128xf32>
      %cst_33 = arith.constant dense<0.000000e+00> : vector<8xf32>
      %54 = vector.multi_reduction <add>, %53, %cst_33 [1] : vector<8x128xf32> to vector<8xf32>
      %55 = vector.shape_cast %54 : vector<8xf32> to vector<8x1xf32>
      %cst_34 = arith.constant 1.280000e+02 : f32
      %56 = vector.broadcast %cst_34 : f32 to vector<8x1xf32>
      %57 = arith.divf %55, %56 : vector<8x1xf32>
      %58 = vector.broadcast %57 : vector<8x1xf32> to vector<8x128xf32>
      %59 = arith.subf %53, %58 : vector<8x128xf32>
      %60 = vector.broadcast %57 : vector<8x1xf32> to vector<8x128xf32>
      %61 = arith.subf %53, %60 : vector<8x128xf32>
      %62 = arith.mulf %59, %61 : vector<8x128xf32>
      %cst_35 = arith.constant dense<0.000000e+00> : vector<8xf32>
      %63 = vector.multi_reduction <add>, %62, %cst_35 [1] : vector<8x128xf32> to vector<8xf32>
      %64 = vector.shape_cast %63 : vector<8xf32> to vector<8x1xf32>
      %cst_36 = arith.constant 1.280000e+02 : f32
      %65 = vector.broadcast %cst_36 : f32 to vector<8x1xf32>
      %66 = arith.divf %64, %65 : vector<8x1xf32>
      %67 = vector.broadcast %57 : vector<8x1xf32> to vector<8x128xf32>
      %68 = arith.subf %53, %67 : vector<8x128xf32>
      %cst_37 = arith.constant 9.99999974E-6 : f32
      %69 = vector.broadcast %cst_37 : f32 to vector<8x1xf32>
      %70 = arith.addf %66, %69 : vector<8x1xf32>
      %71 = math.rsqrt %70 : vector<8x1xf32>
      %72 = vector.broadcast %71 : vector<8x1xf32> to vector<8x128xf32>
      %73 = arith.mulf %68, %72 : vector<8x128xf32>
      %c0_38 = arith.constant 0 : index
      %c0_39 = arith.constant 0 : index
      %74 = vector.load %arg10[%c0_38, %c0_39] : memref<1x128xf32, #tpu.memory_space<vmem>>, vector<1x128xf32>
      %75 = vector.broadcast %74 : vector<1x128xf32> to vector<8x128xf32>
      %76 = arith.mulf %73, %75 : vector<8x128xf32>
      %c0_40 = arith.constant 0 : index
      %c0_41 = arith.constant 0 : index
      %77 = vector.load %arg11[%c0_40, %c0_41] : memref<1x128xf32, #tpu.memory_space<vmem>>, vector<1x128xf32>
      %78 = vector.broadcast %77 : vector<1x128xf32> to vector<8x128xf32>
      %79 = arith.addf %76, %78 : vector<8x128xf32>
      %80 = arith.truncf %79 : vector<8x128xf32> to vector<8x128xbf16>
      %c0_42 = arith.constant 0 : index
      %c0_43 = arith.constant 0 : index
      %81 = vector.load %arg12[%c0_42, %c0_43] : memref<128x128xbf16, #tpu.memory_space<vmem>>, vector<128x128xbf16>
      %cst_44 = arith.constant dense<0.000000e+00> : vector<8x128xf32>
      %82 = tpu.matmul %80, %81, %cst_44 {dimension_numbers = #tpu.dot_dimension_numbers<[1], [0], [0], [1], [0, 0, 1, 1], [], []>} : vector<8x128xbf16>, vector<128x128xbf16>, vector<8x128xf32> -> vector<8x128xf32>
      %c0_45 = arith.constant 0 : index
      %c0_46 = arith.constant 0 : index
      %83 = vector.load %arg13[%c0_45, %c0_46] : memref<1x128xf32, #tpu.memory_space<vmem>>, vector<1x128xf32>
      %84 = vector.broadcast %83 : vector<1x128xf32> to vector<8x128xf32>
      %85 = arith.addf %82, %84 : vector<8x128xf32>
      %cst_47 = arith.constant 0.000000e+00 : f32
      %86 = vector.broadcast %cst_47 : f32 to vector<8x128xf32>
      %87 = arith.maximumf %85, %86 : vector<8x128xf32>
      %88 = arith.truncf %87 : vector<8x128xf32> to vector<8x128xbf16>
      %c0_48 = arith.constant 0 : index
      %c0_49 = arith.constant 0 : index
      %89 = vector.load %arg14[%c0_48, %c0_49] : memref<128x128xbf16, #tpu.memory_space<vmem>>, vector<128x128xbf16>
      %cst_50 = arith.constant dense<0.000000e+00> : vector<8x128xf32>
      %90 = tpu.matmul %88, %89, %cst_50 {dimension_numbers = #tpu.dot_dimension_numbers<[1], [0], [0], [1], [0, 0, 1, 1], [], []>} : vector<8x128xbf16>, vector<128x128xbf16>, vector<8x128xf32> -> vector<8x128xf32>
      %c0_51 = arith.constant 0 : index
      %c0_52 = arith.constant 0 : index
      %91 = vector.load %arg15[%c0_51, %c0_52] : memref<1x128xf32, #tpu.memory_space<vmem>>, vector<1x128xf32>
      %92 = vector.broadcast %91 : vector<1x128xf32> to vector<8x128xf32>
      %93 = arith.addf %90, %92 : vector<8x128xf32>
      %94 = arith.addf %93, %79 : vector<8x128xf32>
      %95 = arith.truncf %94 : vector<8x128xf32> to vector<8x128xbf16>
      %c0_53 = arith.constant 0 : index
      %c0_54 = arith.constant 0 : index
      %96 = vector.load %arg16[%c0_53, %c0_54] : memref<128x128xbf16, #tpu.memory_space<vmem>>, vector<128x128xbf16>
      %cst_55 = arith.constant dense<0.000000e+00> : vector<8x128xf32>
      %97 = tpu.matmul %95, %96, %cst_55 {dimension_numbers = #tpu.dot_dimension_numbers<[1], [0], [0], [1], [0, 0, 1, 1], [], []>} : vector<8x128xbf16>, vector<128x128xbf16>, vector<8x128xf32> -> vector<8x128xf32>
      %c0_56 = arith.constant 0 : index
      %c0_57 = arith.constant 0 : index
      %98 = vector.load %arg17[%c0_56, %c0_57] : memref<1x128xf32, #tpu.memory_space<vmem>>, vector<1x128xf32>
      %99 = vector.broadcast %98 : vector<1x128xf32> to vector<8x128xf32>
      %100 = arith.addf %97, %99 : vector<8x128xf32>
      %101 = arith.truncf %100 : vector<8x128xf32> to vector<8x128xbf16>
      %c0_58 = arith.constant 0 : index
      %c0_59 = arith.constant 0 : index
      %102 = vector.load %arg18[%c0_58, %c0_59] : memref<128x128xbf16, #tpu.memory_space<vmem>>, vector<128x128xbf16>
      %cst_60 = arith.constant dense<0.000000e+00> : vector<8x128xf32>
      %103 = tpu.matmul %101, %102, %cst_60 {dimension_numbers = #tpu.dot_dimension_numbers<[1], [0], [0], [1], [0, 0, 1, 1], [], []>} : vector<8x128xbf16>, vector<128x128xbf16>, vector<8x128xf32> -> vector<8x128xf32>
      %c0_61 = arith.constant 0 : index
      %c0_62 = arith.constant 0 : index
      %104 = vector.load %arg19[%c0_61, %c0_62] : memref<1x128xf32, #tpu.memory_space<vmem>>, vector<1x128xf32>
      %105 = vector.broadcast %104 : vector<1x128xf32> to vector<8x128xf32>
      %106 = arith.addf %103, %105 : vector<8x128xf32>
      %cst_63 = arith.constant 0.000000e+00 : f32
      %107 = vector.broadcast %cst_63 : f32 to vector<8x128xf32>
      %108 = arith.maximumf %106, %107 : vector<8x128xf32>
      %109 = arith.truncf %108 : vector<8x128xf32> to vector<8x128xbf16>
      %c0_64 = arith.constant 0 : index
      %c0_65 = arith.constant 0 : index
      %110 = vector.load %arg20[%c0_64, %c0_65] : memref<128x128xbf16, #tpu.memory_space<vmem>>, vector<128x128xbf16>
      %cst_66 = arith.constant dense<0.000000e+00> : vector<8x128xf32>
      %111 = tpu.matmul %109, %110, %cst_66 {dimension_numbers = #tpu.dot_dimension_numbers<[1], [0], [0], [1], [0, 0, 1, 1], [], []>} : vector<8x128xbf16>, vector<128x128xbf16>, vector<8x128xf32> -> vector<8x128xf32>
      %c0_67 = arith.constant 0 : index
      %c0_68 = arith.constant 0 : index
      %112 = vector.load %arg21[%c0_67, %c0_68] : memref<1x128xf32, #tpu.memory_space<vmem>>, vector<1x128xf32>
      %113 = vector.broadcast %112 : vector<1x128xf32> to vector<8x128xf32>
      %114 = arith.addf %111, %113 : vector<8x128xf32>
      %115 = arith.addf %114, %100 : vector<8x128xf32>
      %c0_69 = arith.constant 0 : index
      %c0_70 = arith.constant 0 : index
      %116 = vector.load %arg25[%c0_69, %c0_70] : memref<8x128xf32, #tpu.memory_space<vmem>>, vector<8x128xf32>
      tpu.vector_store %arg25[%c0_69, %c0_70], %115 {strides = array<i32>} : memref<8x128xf32, #tpu.memory_space<vmem>>, vector<8x128xf32>,
    } else {
    }
    %c0 = arith.constant 0 : index
    %c0_1 = arith.constant 0 : index
    %3 = vector.load %arg25[%c0, %c0_1] : memref<8x128xf32, #tpu.memory_space<vmem>>, vector<8x128xf32>
    %4 = arith.truncf %3 : vector<8x128xf32> to vector<8x128xbf16>
    %c0_2 = arith.constant 0 : index
    %c0_3 = arith.constant 0 : index
    %5 = vector.load %arg22[%c0_2, %c0_3] : memref<128x512xbf16, #tpu.memory_space<vmem>>, vector<128x512xbf16>
    %cst = arith.constant dense<0.000000e+00> : vector<8x512xf32>
    %6 = tpu.matmul %4, %5, %cst {dimension_numbers = #tpu.dot_dimension_numbers<[1], [0], [0], [1], [0, 0, 1, 1], [], []>} : vector<8x128xbf16>, vector<128x512xbf16>, vector<8x512xf32> -> vector<8x512xf32>
    %c0_4 = arith.constant 0 : index
    %c0_5 = arith.constant 0 : index
    %7 = vector.load %arg23[%c0_4, %c0_5] : memref<1x512xf32, #tpu.memory_space<vmem>>, vector<1x512xf32>
    %8 = vector.broadcast %7 : vector<1x512xf32> to vector<8x512xf32>
    %9 = arith.addf %6, %8 : vector<8x512xf32>
    %c0_6 = arith.constant 0 : index
    %c0_7 = arith.constant 0 : index
    %10 = vector.load %arg24[%c0_6, %c0_7] : memref<8x512xf32, #tpu.memory_space<vmem>>, vector<8x512xf32>
    tpu.vector_store %arg24[%c0_6, %c0_7], %9 {strides = array<i32>} : memref<8x512xf32, #tpu.memory_space<vmem>>, vector<8x512xf32>,
    return
  }
  func.func @transform_0(%arg0: i32, %arg1: i32) -> (i32, i32) {
    %c0_i32 = arith.constant 0 : i32
    %c0_i32_0 = arith.constant 0 : i32
    return %arg0, %c0_i32 : i32, i32
  }
  func.func @transform_1(%arg0: i32, %arg1: i32) -> (i32, i32) {
    %c0_i32 = arith.constant 0 : i32
    %c0_i32_0 = arith.constant 0 : i32
    return %arg0, %c0_i32 : i32, i32
  }
  func.func @transform_2(%arg0: i32, %arg1: i32) -> (i32, i32) {
    %c0_i32 = arith.constant 0 : i32
    %c0_i32_0 = arith.constant 0 : i32
    %c0_i32_1 = arith.constant 0 : i32
    return %c0_i32, %c0_i32_0 : i32, i32
  }
  func.func @transform_3(%arg0: i32, %arg1: i32) -> (i32, i32) {
    %c0_i32 = arith.constant 0 : i32
    %c0_i32_0 = arith.constant 0 : i32
    %c0_i32_1 = arith.constant 0 : i32
    return %c0_i32, %c0_i32_0 : i32, i32
  }
  func.func @transform_4(%arg0: i32, %arg1: i32) -> (i32, i32) {
    %c0_i32 = arith.constant 0 : i32
    %c0_i32_0 = arith.constant 0 : i32
    %c0_i32_1 = arith.constant 0 : i32
    return %c0_i32, %c0_i32_0 : i32, i32
  }
  func.func @transform_5(%arg0: i32, %arg1: i32) -> (i32, i32) {
    %c0_i32 = arith.constant 0 : i32
    %c0_i32_0 = arith.constant 0 : i32
    %c0_i32_1 = arith.constant 0 : i32
    return %c0_i32, %c0_i32_0 : i32, i32
  }
  func.func @transform_6(%arg0: i32, %arg1: i32) -> (i32, i32) {
    %c0_i32 = arith.constant 0 : i32
    %c0_i32_0 = arith.constant 0 : i32
    %c0_i32_1 = arith.constant 0 : i32
    return %c0_i32, %c0_i32_0 : i32, i32
  }
  func.func @transform_7(%arg0: i32, %arg1: i32) -> (i32, i32) {
    %c0_i32 = arith.constant 0 : i32
    %c0_i32_0 = arith.constant 0 : i32
    %c0_i32_1 = arith.constant 0 : i32
    return %c0_i32, %c0_i32_0 : i32, i32
  }
  func.func @transform_8(%arg0: i32, %arg1: i32) -> (i32, i32) {
    %c0_i32 = arith.constant 0 : i32
    %c0_i32_0 = arith.constant 0 : i32
    %c0_i32_1 = arith.constant 0 : i32
    return %c0_i32, %c0_i32_0 : i32, i32
  }
  func.func @transform_9(%arg0: i32, %arg1: i32) -> (i32, i32) {
    %c0_i32 = arith.constant 0 : i32
    %c0_i32_0 = arith.constant 0 : i32
    %c0_i32_1 = arith.constant 0 : i32
    return %c0_i32, %c0_i32_0 : i32, i32
  }
  func.func @transform_10(%arg0: i32, %arg1: i32) -> (i32, i32) {
    %c0_i32 = arith.constant 0 : i32
    %c0_i32_0 = arith.constant 0 : i32
    %c0_i32_1 = arith.constant 0 : i32
    return %c0_i32, %c0_i32_0 : i32, i32
  }
  func.func @transform_11(%arg0: i32, %arg1: i32) -> (i32, i32) {
    %c0_i32 = arith.constant 0 : i32
    %c0_i32_0 = arith.constant 0 : i32
    %c0_i32_1 = arith.constant 0 : i32
    return %c0_i32, %c0_i32_0 : i32, i32
  }
  func.func @transform_12(%arg0: i32, %arg1: i32) -> (i32, i32) {
    %c0_i32 = arith.constant 0 : i32
    %c0_i32_0 = arith.constant 0 : i32
    %c0_i32_1 = arith.constant 0 : i32
    return %c0_i32, %c0_i32_0 : i32, i32
  }
  func.func @transform_13(%arg0: i32, %arg1: i32) -> (i32, i32) {
    %c0_i32 = arith.constant 0 : i32
    %c0_i32_0 = arith.constant 0 : i32
    %c0_i32_1 = arith.constant 0 : i32
    return %c0_i32, %c0_i32_0 : i32, i32
  }
  func.func @transform_14(%arg0: i32, %arg1: i32) -> (i32, i32) {
    %c0_i32 = arith.constant 0 : i32
    %c0_i32_0 = arith.constant 0 : i32
    %c0_i32_1 = arith.constant 0 : i32
    return %c0_i32, %c0_i32_0 : i32, i32
  }
  func.func @transform_15(%arg0: i32, %arg1: i32) -> (i32, i32) {
    %c0_i32 = arith.constant 0 : i32
    %c0_i32_0 = arith.constant 0 : i32
    %c0_i32_1 = arith.constant 0 : i32
    return %c0_i32, %c0_i32_0 : i32, i32
  }
  func.func @transform_16(%arg0: i32, %arg1: i32) -> (i32, i32) {
    %c0_i32 = arith.constant 0 : i32
    %c0_i32_0 = arith.constant 0 : i32
    %c0_i32_1 = arith.constant 0 : i32
    return %c0_i32, %c0_i32_0 : i32, i32
  }
  func.func @transform_17(%arg0: i32, %arg1: i32) -> (i32, i32) {
    %c0_i32 = arith.constant 0 : i32
    %c0_i32_0 = arith.constant 0 : i32
    %c0_i32_1 = arith.constant 0 : i32
    return %c0_i32, %c0_i32_0 : i32, i32
  }
  func.func @transform_18(%arg0: i32, %arg1: i32) -> (i32, i32) {
    %c0_i32 = arith.constant 0 : i32
    %c0_i32_0 = arith.constant 0 : i32
    %c0_i32_1 = arith.constant 0 : i32
    return %c0_i32, %c0_i32_0 : i32, i32
  }
  func.func @transform_19(%arg0: i32, %arg1: i32) -> (i32, i32) {
    %c0_i32 = arith.constant 0 : i32
    %c0_i32_0 = arith.constant 0 : i32
    %c0_i32_1 = arith.constant 0 : i32
    return %c0_i32, %c0_i32_0 : i32, i32
  }
  func.func @transform_20(%arg0: i32, %arg1: i32) -> (i32, i32) {
    %c0_i32 = arith.constant 0 : i32
    %c0_i32_0 = arith.constant 0 : i32
    return %c0_i32, %arg1 : i32, i32
  }
  func.func @transform_21(%arg0: i32, %arg1: i32) -> (i32, i32) {
    %c0_i32 = arith.constant 0 : i32
    %c0_i32_0 = arith.constant 0 : i32
    return %c0_i32, %arg1 : i32, i32
  }
  func.func @transform_22(%arg0: i32, %arg1: i32) -> (i32, i32) {
    %c0_i32 = arith.constant 0 : i32
    return %arg0, %arg1 : i32, i32
  }
}

</mosaic_0001>

<bundles_post_ra>
// kernel: tpu_custom_call.1
= control target key start
LH: loop header
LB: loop body
LE: loop exit
PB: predicated region body
PF: predicated region fallthrough
CT: control target
= control target key end

     0   :  { %s5033_s0 = inlined_call_operand.hbm [shape: f32[16,128], index: 0, kind: input, shape index: {}]   ;;  %s5034_s1 = inlined_call_operand.hbm [shape: f32[16,128], index: 1, kind: input, shape index: {}]   ;;  %s5035_s2 = inlined_call_operand.hbm [shape: bf16[128,128], index: 2, kind: input, shape index: {}]   ;;  %s5036_s3 = inlined_call_operand.hbm [shape: f32[1,128], index: 3, kind: input, shape index: {}]   ;;  %s5037_s4 = inlined_call_operand.hbm [shape: bf16[128,256], index: 4, kind: input, shape index: {}]   ;;  %s5038_s5 = inlined_call_operand.hbm [shape: f32[1,256], index: 5, kind: input, shape index: {}]   ;;  %s5039_s6 = inlined_call_operand.hbm [shape: bf16[128,128], index: 6, kind: input, shape index: {}]   ;;  %s5040_s7 = inlined_call_operand.hbm [shape: f32[1,128], index: 7, kind: input, shape index: {}]   ;;  %s5041_s8 = inlined_call_operand.hbm [shape: f32[1,128], index: 8, kind: input, shape index: {}]   ;;  %s5042_s9 = inlined_call_operand.hbm [shape: f32[1,128], index: 9, kind: input, shape index: {}]   ;;  %s5043_s10 = inlined_call_operand.hbm [shape: bf16[128,128], index: 10, kind: input, shape index: {}]   ;;  %s5044_s11 = inlined_call_operand.hbm [shape: f32[1,128], index: 11, kind: input, shape index: {}]   ;;  %s5045_s12 = inlined_call_operand.hbm [shape: bf16[128,128], index: 12, kind: input, shape index: {}]   ;;  %s5046_s13 = inlined_call_operand.hbm [shape: f32[1,128], index: 13, kind: input, shape index: {}]   ;;  %s5047_s14 = inlined_call_operand.hbm [shape: bf16[128,128], index: 14, kind: input, shape index: {}]   ;;  %s5048_s15 = inlined_call_operand.hbm [shape: f32[1,128], index: 15, kind: input, shape index: {}]   ;;  %s5049_s16 = inlined_call_operand.hbm [shape: bf16[128,128], index: 16, kind: input, shape index: {}]   ;;  %s5050_s17 = inlined_call_operand.hbm [shape: f32[1,128], index: 17, kind: input, shape index: {}]   ;;  %s5051_s18 = inlined_call_operand.vmem [shape: bf16[128,128], index: 18, kind: input, shape index: {}]   ;;  %s5052_s19 = inlined_call_operand.vmem [shape: f32[1,128], index: 19, kind: input, shape index: {}]   ;;  %s5053_s20 = inlined_call_operand.hbm [shape: bf16[128,512], index: 20, kind: input, shape index: {}]   ;;  %s5054_s21 = inlined_call_operand.vmem [shape: f32[1,512], index: 21, kind: input, shape index: {}]   ;;  %s5055_s22 = inlined_call_operand.hbm [shape: f32[16,512], index: 22, kind: output, shape index: {}]  }
   0x1   :  { %5082 = sst [smem:[#allocation53_spill]] %s5033_s0 }
   0x2   :  { %5083 = sst [smem:[#allocation54_spill]] %s5034_s1 }
   0x3   :  { %5084 = sst [smem:[#allocation55_spill]] %s5035_s2 }
   0x4   :  { %5085 = sst [smem:[#allocation56_spill]] %s5036_s3 }
   0x5   :  { %5086 = sst [smem:[#allocation57_spill]] %s5037_s4 }
   0x6   :  { %5087 = sst [smem:[#allocation58_spill]] %s5038_s5 }
   0x7   :  { %5088 = sst [smem:[#allocation59_spill]] %s5039_s6 }
   0x8   :  { %5089 = sst [smem:[#allocation60_spill]] %s5040_s7 }
   0x9   :  { %5090 = sst [smem:[#allocation61_spill]] %s5041_s8 }
   0xa   :  { %5091 = sst [smem:[#allocation62_spill]] %s5042_s9 }
   0xb   :  { %5092 = sst [smem:[#allocation63_spill]] %s5043_s10 }
   0xc   :  { %5093 = sst [smem:[#allocation64_spill]] %s5044_s11 }
   0xd   :  { %5094 = sst [smem:[#allocation65_spill]] %s5045_s12 }
   0xe   :  { %5095 = sst [smem:[#allocation66_spill]] %s5046_s13 }
   0xf   :  { %5096 = sst [smem:[#allocation67_spill]] %s5047_s14 }
  0x10   :  { %5097 = sst [smem:[#allocation68_spill]] %s5051_s18 }
  0x11   :  { %5098 = sst [smem:[#allocation69_spill]] %s5052_s19 }
  0x12   :  { %5099 = sst [smem:[#allocation70_spill]] %s5054_s21 }
  0x13   :  { %5100 = sst [smem:[#allocation71_spill]] %s5055_s22 }
  0x14   :  { %27 = vsyncpa [#allocation4], 0 }
  0x15   :  { %29 = vsyncpa [#allocation4 + $0x1], 0 }
  0x16   :  { %30 = vsyncpa [#allocation7], 0 }
  0x17   :  { %32 = vsyncpa [#allocation7 + $0x1], 0 }
  0x18   :  { %33 = vsyncpa [#allocation10], 0 }
  0x19   :  { %34 = vsyncpa [#allocation13], 0 }
  0x1a   :  { %35 = vsyncpa [#allocation16], 0 }
  0x1b   :  { %36 = vsyncpa [#allocation19], 0 }
  0x1c   :  { %37 = vsyncpa [#allocation22], 0 }
  0x1d   :  { %38 = vsyncpa [#allocation25], 0 }
  0x1e   :  { %39 = vsyncpa [#allocation28], 0 }
  0x1f   :  { %40 = vsyncpa [#allocation31], 0 }
  0x20   :  { %41 = vsyncpa [#allocation5], 0 }
  0x21   :  { %43 = vsyncpa [#allocation5 + $0x1], 0  ;;  %s4255_s3 = smov 0   ;;  %s4257_s28 = smov 0  }
  0x22   :  { %s4259_s29 = smov 0   ;;  %s4261_s30 = smov 0  }
  0x23   :  { %s4263_s4 = smov 0   ;;  %s4265_s0 = smov 0  }
  0x24 LB: > { %5101 = sst [smem:[#allocation46_spill]] %s4089_s3  ;;  %s4286_s23 = sadd.s32 4294967295, %s4109_s0   ;;  %s4109_s0 = sphi %s4265_s0, %s49_s0   ;;  %s4105_s4 = sphi %s4263_s4, %s5179_s4   ;;  %s4101_s30 = sphi %s4261_s30, %s5175_s30   ;;  %s4097_s29 = sphi %s4259_s29, %s5178_s29   ;;  %s4093_s28 = sphi %s4257_s28, %s5174_s28   ;;  %s4089_s3 = sphi %s4255_s3, %s5177_s3  }
  0x25   : > { %5102 = sst [smem:[#allocation47_spill]] %s4093_s28  ;;  %p2686_p0 = scmp.ge.s32.totalorder %s4109_s0, 1 }
  0x26   : > { %5103 = sst [smem:[#allocation48_spill]] %s4097_s29  ;;  %p5072_p1 = scmp.eq.s32.totalorder %s4286_s23, 0 }
  0x27   : > { %5104 = sst [smem:[#allocation49_spill]] %s4101_s30  ;;  %p576_p2 = scmp.lt.s32.totalorder %s4109_s0, 3 }
  0x28   : > { %5105 = sst [smem:[#allocation50_spill]] %s4105_s4  ;;  %s4111_s5 = smov [#allocation8]  }
  0x29   : > { %5106 = sst [smem:[#allocation51_spill]] %s4286_s23  ;;  %p4291_p3 = pnand %p2686_p0, %p576_p2 }
  0x2a   : > { %s588_s24 = sshll.u32 %s4111_s5, 4  ;;  %s4112_s25 = smov [#allocation9]   ;;  %s4295_s24 = int_to_ptr.vmem [resolvable:$true] %s588_s24 }
  0x2b   : > { %s5107_s1 = scalar_select %p4291_p3, 1, 0 }
  0x2c   : > { %p3144_p4 = pneg %p4291_p3  ;;  %s602_s26 = sshll.u32 %s4112_s25, 4  ;;  %s4306_s26 = int_to_ptr.vmem [resolvable:$true] %s602_s26 }
  0x2d   : > { %5108 = sst [smem:[#allocation52_spill]] %s5107_s1  ;;  %s4113_s2 = smov [#allocation12]  }
  0x2e   : > { %p4302_p6 = pnand %p3144_p4, %p5072_p1  ;;  %s4308_s27 = sshll.u32 %s4113_s2, 4  ;;  %s627_s27 = int_to_ptr.vmem [resolvable:$true] %s4308_s27 }
  0x2f   : > { %s5110_s21 = sld [smem:[#allocation55_spill]] }
  0x30   : > { %p4318_p8 = pneg %p4302_p6 }
  0x35   : > { %s3451_s30 = scalar_lea.hbm %s5110_s21, 1024 }
  0x36   : > { %p3452_p7 = scmp.ne.s32.totalorder %s5110_s21, %s3451_s30  ;;  %p3458_p11 = scmp.lt.u32.totalorder %s3451_s30, %s5110_s21 }
  0x38   : > { %p3454_p9 = pnand %p4318_p8, %p3452_p7 }
  0x3a   : > { %p3455_p10 = pneg %p3454_p9 }
  0x3c   : > { %p3460_p12 = pnand %p3458_p11, %p3455_p10 }
  0x3e   : > { %3463 = shalt.err (!%p3460_p12)
}
  0x3f   : > { %s3464_s18 = scalar_lea.vmem %s4295_s24, 1024  ;;  %p3472_p4 = scmp.lt.s32.totalorder %s4295_s24, %s4295_s24 }
  0x40   : > { %p3465_p13 = scmp.ne.s32.totalorder %s4295_s24, %s3464_s18  ;;  %p3473_p5 = scmp.lt.s32.totalorder %s3464_s18, %s3464_s18 }
  0x42   : > { %p3467_p0 = pnand %p3465_p13, %p4318_p8  ;;  %p3474_p7 = por %p3473_p5, %p3472_p4 }
  0x44   : > { %p3468_p2 = pneg %p3467_p0 }
  0x46   : > { %p3475_p9 = pnand %p3474_p7, %p3468_p2 }
  0x48   : > { %3478 = shalt.err (!%p3475_p9)
}
  0x49   : > { %s5074_s19 = smov 64   ;;  %s5076_s22 = smov 4  }
  0x4a   : > { %3147 = dma.hbm_to_vmem [thread:$0]  (!%p4302_p6), %s5110_s21, 1024, %s4295_s24, [#allocation7], %s5074_s19, %s5074_s19, %s5076_s22  }
  0x4b   : > { %s5112_s23 = sld [smem:[#allocation56_spill]] }
  0x51   : > { %s3479_s18 = scalar_lea.hbm %s5112_s23, 16 }
  0x52   : > { %p3480_p5 = scmp.ne.s32.totalorder %s5112_s23, %s3479_s18  ;;  %p3486_p12 = scmp.lt.u32.totalorder %s3479_s18, %s5112_s23 }
  0x54   : > { %p3482_p10 = pnand %p3480_p5, %p4318_p8 }
  0x56   : > { %p3483_p11 = pneg %p3482_p10 }
  0x58   : > { %p3488_p13 = pnand %p3486_p12, %p3483_p11 }
  0x5a   : > { %3491 = shalt.err (!%p3488_p13)
}
  0x5b   : > { %s3492_s24 = scalar_lea.vmem %s4306_s26, 16  ;;  %s3499_s3 = scalar_lea.vmem %s4306_s26, 32 }
  0x5c   : > { %p3493_p0 = scmp.ne.s32.totalorder %s4306_s26, %s3492_s24  ;;  %p3500_p7 = scmp.lt.s32.totalorder %s4306_s26, %s4306_s26 }
  0x5d   : > { %p3501_p9 = scmp.lt.s32.totalorder %s3499_s3, %s3492_s24 }
  0x5e   : > { %p3495_p2 = pnand %p3493_p0, %p4318_p8 }
  0x5f   : > { %p3502_p5 = por %p3501_p9, %p3500_p7 }
  0x60   : > { %p3496_p4 = pneg %p3495_p2 }
  0x62   : > { %p3503_p10 = pnand %p3502_p5, %p3496_p4 }
  0x64   : > { %3506 = shalt.err (!%p3503_p10)
}
  0x65   : > { %3150 = dma.hbm_to_vmem [thread:$0]  (!%p4302_p6), %s5112_s23, 16, %s4306_s26, [#allocation10]  }
  0x66   : > { %s5113_s5 = sld [smem:[#allocation58_spill]] }
  0x6c   : > { %s3507_s25 = scalar_lea.hbm %s5113_s5, 32 }
  0x6d   : > { %p3508_p11 = scmp.ne.s32.totalorder %s5113_s5, %s3507_s25  ;;  %p3514_p0 = scmp.lt.u32.totalorder %s3507_s25, %s5113_s5 }
  0x6f   : > { %p3510_p12 = pnand %p3508_p11, %p4318_p8 }
  0x71   : > { %p3511_p13 = pneg %p3510_p12 }
  0x73   : > { %p3516_p2 = pnand %p3514_p0, %p3511_p13 }
  0x75   : > { %3519 = shalt.err (!%p3516_p2)
}
  0x76   : > { %s3520_s28 = scalar_lea.vmem %s627_s27, 32  ;;  %p3528_p5 = scmp.lt.s32.totalorder %s627_s27, %s627_s27 }
  0x77   : > { %p3521_p4 = scmp.ne.s32.totalorder %s627_s27, %s3520_s28  ;;  %p3529_p10 = scmp.lt.s32.totalorder %s3520_s28, %s3520_s28 }
  0x79   : > { %p3523_p7 = pnand %p3521_p4, %p4318_p8  ;;  %p3530_p1 = por %p3529_p10, %p3528_p5 }
  0x7b   : > { %p3524_p9 = pneg %p3523_p7 }
  0x7d   : > { %p3531_p3 = pnand %p3530_p1, %p3524_p9 }
  0x7f   : > { %3534 = shalt.err (!%p3531_p3)
}
  0x80   : > { %3156 = dma.hbm_to_vmem [thread:$0]  (!%p4302_p6), %s5113_s5, 32, %s627_s27, [#allocation13]  }
  0x81   : > { %s4116_s4 = smov [#allocation15]   ;;  %s4117_s25 = smov [#allocation18]  }
  0x82   : > { %s650_s30 = sshll.u32 %s4116_s4, 4  ;;  %s672_s2 = sshll.u32 %s4117_s25, 4  ;;  %s651_s30 = int_to_ptr.vmem [resolvable:$true] %s650_s30  ;;  %s673_s2 = int_to_ptr.vmem [resolvable:$true] %s672_s2 }
  0x83   : > { %s5114_s7 = sld [smem:[#allocation60_spill]] }
  0x89   : > { %s3535_s3 = scalar_lea.hbm %s5114_s7, 16 }
  0x8a   : > { %p3536_p1 = scmp.ne.s32.totalorder %s5114_s7, %s3535_s3  ;;  %p3542_p12 = scmp.lt.u32.totalorder %s3535_s3, %s5114_s7 }
  0x8c   : > { %p3538_p3 = pnand %p3536_p1, %p4318_p8 }
  0x8e   : > { %p3539_p11 = pneg %p3538_p3 }
  0x90   : > { %p3544_p13 = pnand %p3542_p12, %p3539_p11 }
  0x92   : > { %3547 = shalt.err (!%p3544_p13)
}
  0x93   : > { %s3548_s27 = scalar_lea.vmem %s651_s30, 16  ;;  %s3555_s29 = scalar_lea.vmem %s651_s30, 32 }
  0x94   : > { %p3549_p0 = scmp.ne.s32.totalorder %s651_s30, %s3548_s27  ;;  %p3556_p7 = scmp.lt.s32.totalorder %s651_s30, %s651_s30 }
  0x95   : > { %p3557_p9 = scmp.lt.s32.totalorder %s3555_s29, %s3548_s27 }
  0x96   : > { %p3551_p2 = pnand %p3549_p0, %p4318_p8 }
  0x97   : > { %p3558_p5 = por %p3557_p9, %p3556_p7 }
  0x98   : > { %p3552_p4 = pneg %p3551_p2 }
  0x9a   : > { %p3559_p10 = pnand %p3558_p5, %p3552_p4 }
  0x9c   : > { %3562 = shalt.err (!%p3559_p10)
}
  0x9d   : > { %3162 = dma.hbm_to_vmem [thread:$0]  (!%p4302_p6), %s5114_s7, 16, %s651_s30, [#allocation16]  }
  0x9e   : > { %s5115_s9 = sld [smem:[#allocation62_spill]] }
  0xa4   : > { %s3563_s18 = scalar_lea.hbm %s5115_s9, 16 }
  0xa5   : > { %p3564_p1 = scmp.ne.s32.totalorder %s5115_s9, %s3563_s18  ;;  %p3570_p12 = scmp.lt.u32.totalorder %s3563_s18, %s5115_s9 }
  0xa7   : > { %p3566_p3 = pnand %p3564_p1, %p4318_p8 }
  0xa9   : > { %p3567_p11 = pneg %p3566_p3 }
  0xab   : > { %p3572_p13 = pnand %p3570_p12, %p3567_p11 }
  0xad   : > { %3575 = shalt.err (!%p3572_p13)
}
  0xae   : > { %s3576_s27 = scalar_lea.vmem %s673_s2, 16  ;;  %s3583_s30 = scalar_lea.vmem %s673_s2, 32 }
  0xaf   : > { %p3577_p0 = scmp.ne.s32.totalorder %s673_s2, %s3576_s27  ;;  %p3584_p7 = scmp.lt.s32.totalorder %s673_s2, %s673_s2 }
  0xb0   : > { %p3585_p9 = scmp.lt.s32.totalorder %s3583_s30, %s3576_s27 }
  0xb1   : > { %p3579_p2 = pnand %p3577_p0, %p4318_p8 }
  0xb2   : > { %p3586_p5 = por %p3585_p9, %p3584_p7 }
  0xb3   : > { %p3580_p4 = pneg %p3579_p2 }
  0xb5   : > { %p3587_p10 = pnand %p3586_p5, %p3580_p4 }
  0xb7   : > { %3590 = shalt.err (!%p3587_p10)
}
  0xb8   : > { %3168 = dma.hbm_to_vmem [thread:$0]  (!%p4302_p6), %s5115_s9, 16, %s673_s2, [#allocation19]  }
  0xb9   : > { %s4118_s4 = smov [#allocation21]   ;;  %s4119_s25 = smov [#allocation24]  }
  0xba   : > { %s696_s22 = sshll.u32 %s4118_s4, 4  ;;  %s720_s18 = sshll.u32 %s4119_s25, 4  ;;  %s697_s22 = int_to_ptr.vmem [resolvable:$true] %s696_s22  ;;  %s721_s18 = int_to_ptr.vmem [resolvable:$true] %s720_s18 }
  0xbb   : > { %s5116_s11 = sld [smem:[#allocation64_spill]] }
  0xc1   : > { %s3591_s28 = scalar_lea.hbm %s5116_s11, 16 }
  0xc2   : > { %p3592_p1 = scmp.ne.s32.totalorder %s5116_s11, %s3591_s28  ;;  %p3598_p12 = scmp.lt.u32.totalorder %s3591_s28, %s5116_s11 }
  0xc4   : > { %p3594_p3 = pnand %p3592_p1, %p4318_p8 }
  0xc6   : > { %p3595_p11 = pneg %p3594_p3 }
  0xc8   : > { %p3600_p13 = pnand %p3598_p12, %p3595_p11 }
  0xca   : > { %3603 = shalt.err (!%p3600_p13)
}
  0xcb   : > { %s3604_s2 = scalar_lea.vmem %s697_s22, 16  ;;  %s3611_s19 = scalar_lea.vmem %s697_s22, 32 }
  0xcc   : > { %p3605_p0 = scmp.ne.s32.totalorder %s697_s22, %s3604_s2  ;;  %p3612_p7 = scmp.lt.s32.totalorder %s697_s22, %s697_s22 }
  0xcd   : > { %p3613_p9 = scmp.lt.s32.totalorder %s3611_s19, %s3604_s2 }
  0xce   : > { %p3607_p2 = pnand %p3605_p0, %p4318_p8 }
  0xcf   : > { %p3614_p5 = por %p3613_p9, %p3612_p7 }
  0xd0   : > { %p3608_p4 = pneg %p3607_p2 }
  0xd2   : > { %p3615_p10 = pnand %p3614_p5, %p3608_p4 }
  0xd4   : > { %3618 = shalt.err (!%p3615_p10)
}
  0xd5   : > { %3174 = dma.hbm_to_vmem [thread:$0]  (!%p4302_p6), %s5116_s11, 16, %s697_s22, [#allocation22]  }
  0xd6   : > { %s5117_s13 = sld [smem:[#allocation66_spill]] }
  0xdc   : > { %s3619_s28 = scalar_lea.hbm %s5117_s13, 16 }
  0xdd   : > { %p3620_p1 = scmp.ne.s32.totalorder %s5117_s13, %s3619_s28  ;;  %p3626_p12 = scmp.lt.u32.totalorder %s3619_s28, %s5117_s13 }
  0xdf   : > { %p3622_p3 = pnand %p3620_p1, %p4318_p8 }
  0xe1   : > { %p3623_p11 = pneg %p3622_p3 }
  0xe3   : > { %p3628_p13 = pnand %p3626_p12, %p3623_p11 }
  0xe5   : > { %3631 = shalt.err (!%p3628_p13)
}
  0xe6   : > { %s3632_s2 = scalar_lea.vmem %s721_s18, 16  ;;  %s3639_s22 = scalar_lea.vmem %s721_s18, 32 }
  0xe7   : > { %p3633_p0 = scmp.ne.s32.totalorder %s721_s18, %s3632_s2  ;;  %p3640_p7 = scmp.lt.s32.totalorder %s721_s18, %s721_s18 }
  0xe8   : > { %p3641_p9 = scmp.lt.s32.totalorder %s3639_s22, %s3632_s2 }
  0xe9   : > { %p3635_p2 = pnand %p3633_p0, %p4318_p8 }
  0xea   : > { %p3642_p5 = por %p3641_p9, %p3640_p7 }
  0xeb   : > { %p3636_p4 = pneg %p3635_p2 }
  0xed   : > { %p3643_p10 = pnand %p3642_p5, %p3636_p4 }
  0xef   : > { %3646 = shalt.err (!%p3643_p10)
}
  0xf0   : > { %3180 = dma.hbm_to_vmem [thread:$0]  (!%p4302_p6), %s5117_s13, 16, %s721_s18, [#allocation25]  }
  0xf1   : > { %s4120_s25 = smov [#allocation27]   ;;  %s4121_s3 = smov [#allocation30]  }
  0xf2   : > { %s744_s24 = sshll.u32 %s4120_s25, 4  ;;  %s768_s28 = sshll.u32 %s4121_s3, 4  ;;  %s745_s24 = int_to_ptr.vmem [resolvable:$true] %s744_s24  ;;  %s769_s28 = int_to_ptr.vmem [resolvable:$true] %s768_s28 }
  0xf3   : > { %s3647_s30 = scalar_lea.hbm %s5048_s15, 16 }
  0xf4   : > { %p3648_p1 = scmp.ne.s32.totalorder %s5048_s15, %s3647_s30  ;;  %p3654_p12 = scmp.lt.u32.totalorder %s3647_s30, %s5048_s15 }
  0xf6   : > { %p3650_p3 = pnand %p3648_p1, %p4318_p8 }
  0xf8   : > { %p3651_p11 = pneg %p3650_p3 }
  0xfa   : > { %p3656_p13 = pnand %p3654_p12, %p3651_p11 }
  0xfc   : > { %3659 = shalt.err (!%p3656_p13)
}
  0xfd   : > { %s3660_s18 = scalar_lea.vmem %s745_s24, 16  ;;  %s3667_s4 = scalar_lea.vmem %s745_s24, 32 }
  0xfe   : > { %p3661_p0 = scmp.ne.s32.totalorder %s745_s24, %s3660_s18  ;;  %p3668_p7 = scmp.lt.s32.totalorder %s745_s24, %s745_s24 }
  0xff   : > { %p3669_p9 = scmp.lt.s32.totalorder %s3667_s4, %s3660_s18 }
 0x100   : > { %p3663_p2 = pnand %p3661_p0, %p4318_p8 }
 0x101   : > { %p3670_p5 = por %p3669_p9, %p3668_p7 }
 0x102   : > { %p3664_p4 = pneg %p3663_p2 }
 0x104   : > { %p3671_p10 = pnand %p3670_p5, %p3664_p4 }
 0x106   : > { %3674 = shalt.err (!%p3671_p10)
}
 0x107   : > { %3186 = dma.hbm_to_vmem [thread:$0]  (!%p4302_p6), %s5048_s15, 16, %s745_s24, [#allocation28]  }
 0x108   : > { %s3675_s30 = scalar_lea.hbm %s5050_s17, 16 }
 0x109   : > { %p3676_p1 = scmp.ne.s32.totalorder %s5050_s17, %s3675_s30  ;;  %p3682_p12 = scmp.lt.u32.totalorder %s3675_s30, %s5050_s17 }
 0x10b   : > { %p3678_p3 = pnand %p3676_p1, %p4318_p8 }
 0x10d   : > { %p3679_p11 = pneg %p3678_p3 }
 0x10f   : > { %p3684_p13 = pnand %p3682_p12, %p3679_p11 }
 0x111   : > { %3687 = shalt.err (!%p3684_p13)
}
 0x112   : > { %s3688_s18 = scalar_lea.vmem %s769_s28, 16  ;;  %s3695_s24 = scalar_lea.vmem %s769_s28, 32 }
 0x113   : > { %p3689_p0 = scmp.ne.s32.totalorder %s769_s28, %s3688_s18  ;;  %p3696_p7 = scmp.lt.s32.totalorder %s769_s28, %s769_s28 }
 0x114   : > { %p3697_p9 = scmp.lt.s32.totalorder %s3695_s24, %s3688_s18 }
 0x115   : > { %p3691_p2 = pnand %p3689_p0, %p4318_p8 }
 0x116   : > { %p3698_p5 = por %p3697_p9, %p3696_p7 }
 0x117   : > { %p3692_p4 = pneg %p3691_p2 }
 0x119   : > { %p3699_p10 = pnand %p3698_p5, %p3692_p4 }
 0x11b   : > { %3702 = shalt.err (!%p3699_p10)
}
 0x11c   : > { %3192 = dma.hbm_to_vmem [thread:$0]  (!%p4302_p6), %s5050_s17, 16, %s769_s28, [#allocation31]  }
 0x11d   : > { %s4122_s3 = smov [#allocation11]   ;;  %s5118_s29 = sld [smem:[#allocation57_spill]] }
 0x11e   : > { %s612_s26 = sshll.u32 %s4122_s3, 4  ;;  %s613_s26 = int_to_ptr.vmem [resolvable:$true] %s612_s26 }
 0x123   : > { %s5119_s2 = smov %s5118_s29  ;;  %s3703_s22 = scalar_lea.hbm %s5118_s29, 2048 }
 0x124   : > { %p3704_p1 = scmp.ne.s32.totalorder %s5119_s2, %s3703_s22  ;;  %p3710_p12 = scmp.lt.u32.totalorder %s3703_s22, %s5119_s2 }
 0x126   : > { %p3706_p3 = pnand %p3704_p1, %p4318_p8 }
 0x128   : > { %p3707_p11 = pneg %p3706_p3 }
 0x12a   : > { %p3712_p13 = pnand %p3710_p12, %p3707_p11 }
 0x12c   : > { %3715 = shalt.err (!%p3712_p13)
}
 0x12d   : > { %s3716_s28 = scalar_lea.vmem %s613_s26, 2048  ;;  %p3724_p7 = scmp.lt.s32.totalorder %s613_s26, %s613_s26 }
 0x12e   : > { %p3717_p0 = scmp.ne.s32.totalorder %s613_s26, %s3716_s28  ;;  %p3725_p9 = scmp.lt.s32.totalorder %s3716_s28, %s3716_s28 }
 0x130   : > { %p3719_p2 = pnand %p3717_p0, %p4318_p8  ;;  %p3726_p5 = por %p3725_p9, %p3724_p7 }
 0x132   : > { %p3720_p4 = pneg %p3719_p2 }
 0x134   : > { %p3727_p10 = pnand %p3726_p5, %p3720_p4 }
 0x136   : > { %3730 = shalt.err (!%p3727_p10)
}
 0x137   : > { %s4123_s5 = smov 128   ;;  %s4124_s4 = smov 8  }
 0x138   : > { %3153 = dma.hbm_to_vmem [thread:$0]  (!%p4302_p6), %s5119_s2, 2048, %s613_s26, [#allocation10], %s4123_s5, %s4123_s5, %s4124_s4  }
 0x139   : > { %s4125_s27 = smov [#allocation14]   ;;  %s4126_s29 = smov [#allocation17]  }
 0x13a   : > { %s636_s30 = sshll.u32 %s4125_s27, 4  ;;  %s661_s22 = sshll.u32 %s4126_s29, 4  ;;  %s637_s30 = int_to_ptr.vmem [resolvable:$true] %s636_s30  ;;  %s4511_s22 = int_to_ptr.vmem [resolvable:$true] %s661_s22 }
 0x13b   : > { %s5120_s24 = sld [smem:[#allocation59_spill]] }
 0x141   : > { %s3731_s28 = scalar_lea.hbm %s5120_s24, 1024 }
 0x142   : > { %p3732_p1 = scmp.ne.s32.totalorder %s5120_s24, %s3731_s28  ;;  %p3738_p12 = scmp.lt.u32.totalorder %s3731_s28, %s5120_s24 }
 0x144   : > { %p3734_p3 = pnand %p3732_p1, %p4318_p8 }
 0x146   : > { %p3735_p11 = pneg %p3734_p3 }
 0x148   : > { %p3740_p13 = pnand %p3738_p12, %p3735_p11 }
 0x14a   : > { %3743 = shalt.err (!%p3740_p13)
}
 0x14b   : > { %s3744_s5 = scalar_lea.vmem %s637_s30, 1024  ;;  %p3752_p7 = scmp.lt.s32.totalorder %s637_s30, %s637_s30 }
 0x14c   : > { %p3745_p0 = scmp.ne.s32.totalorder %s637_s30, %s3744_s5  ;;  %p3753_p9 = scmp.lt.s32.totalorder %s3744_s5, %s3744_s5 }
 0x14e   : > { %p3747_p2 = pnand %p3745_p0, %p4318_p8  ;;  %p3754_p5 = por %p3753_p9, %p3752_p7 }
 0x150   : > { %p3748_p4 = pneg %p3747_p2 }
 0x152   : > { %p3755_p10 = pnand %p3754_p5, %p3748_p4 }
 0x154   : > { %3758 = shalt.err (!%p3755_p10)
}
 0x155   : > { %s5121_s7 = smov 4   ;;  %s5122_s9 = smov 64  }
 0x156   : > { %3159 = dma.hbm_to_vmem [thread:$0]  (!%p4302_p6), %s5120_s24, 1024, %s637_s30, [#allocation13], %s5122_s9, %s5122_s9, %s5121_s7  }
 0x157   : > { %s5123_s8 = sld [smem:[#allocation61_spill]] }
 0x15d   : > { %s3759_s19 = scalar_lea.hbm %s5123_s8, 16 }
 0x15e   : > { %p3760_p1 = scmp.ne.s32.totalorder %s5123_s8, %s3759_s19  ;;  %p3766_p12 = scmp.lt.u32.totalorder %s3759_s19, %s5123_s8 }
 0x160   : > { %p3762_p3 = pnand %p3760_p1, %p4318_p8 }
 0x162   : > { %p3763_p11 = pneg %p3762_p3 }
 0x164   : > { %p3768_p13 = pnand %p3766_p12, %p3763_p11 }
 0x166   : > { %3771 = shalt.err (!%p3768_p13)
}
 0x167   : > { %s3772_s30 = scalar_lea.vmem %s4511_s22, 16  ;;  %s3779_s5 = scalar_lea.vmem %s4511_s22, 32 }
 0x168   : > { %p3773_p0 = scmp.ne.s32.totalorder %s4511_s22, %s3772_s30  ;;  %p3780_p7 = scmp.lt.s32.totalorder %s4511_s22, %s4511_s22 }
 0x169   : > { %p3781_p9 = scmp.lt.s32.totalorder %s3779_s5, %s3772_s30 }
 0x16a   : > { %p3775_p2 = pnand %p3773_p0, %p4318_p8 }
 0x16b   : > { %p3782_p5 = por %p3781_p9, %p3780_p7 }
 0x16c   : > { %p3776_p4 = pneg %p3775_p2 }
 0x16e   : > { %p3783_p10 = pnand %p3782_p5, %p3776_p4 }
 0x170   : > { %3786 = shalt.err (!%p3783_p10)
}
 0x171   : > { %3165 = dma.hbm_to_vmem [thread:$0]  (!%p4302_p6), %s5123_s8, 16, %s4511_s22, [#allocation16]  }
 0x172   : > { %s4127_s27 = smov [#allocation20]   ;;  %s4128_s19 = smov [#allocation23]  }
 0x173   : > { %s682_s29 = sshll.u32 %s4127_s27, 4  ;;  %s706_s18 = sshll.u32 %s4128_s19, 4  ;;  %s683_s29 = int_to_ptr.vmem [resolvable:$true] %s682_s29  ;;  %s4558_s18 = int_to_ptr.vmem [resolvable:$true] %s706_s18 }
 0x174   : > { %s5124_s10 = sld [smem:[#allocation63_spill]] }
 0x17a   : > { %s3787_s26 = scalar_lea.hbm %s5124_s10, 1024 }
 0x17b   : > { %p3788_p1 = scmp.ne.s32.totalorder %s5124_s10, %s3787_s26  ;;  %p3794_p12 = scmp.lt.u32.totalorder %s3787_s26, %s5124_s10 }
 0x17d   : > { %p3790_p3 = pnand %p3788_p1, %p4318_p8 }
 0x17f   : > { %p3791_p11 = pneg %p3790_p3 }
 0x181   : > { %p3796_p13 = pnand %p3794_p12, %p3791_p11 }
 0x183   : > { %3799 = shalt.err (!%p3796_p13)
}
 0x184   : > { %s3800_s3 = scalar_lea.vmem %s683_s29, 1024  ;;  %p3808_p7 = scmp.lt.s32.totalorder %s683_s29, %s683_s29 }
 0x185   : > { %p3801_p0 = scmp.ne.s32.totalorder %s683_s29, %s3800_s3  ;;  %p3809_p9 = scmp.lt.s32.totalorder %s3800_s3, %s3800_s3 }
 0x187   : > { %p3803_p2 = pnand %p3801_p0, %p4318_p8  ;;  %p3810_p5 = por %p3809_p9, %p3808_p7 }
 0x189   : > { %p3804_p4 = pneg %p3803_p2 }
 0x18b   : > { %p3811_p10 = pnand %p3810_p5, %p3804_p4 }
 0x18d   : > { %3814 = shalt.err (!%p3811_p10)
}
 0x18e   : > { %3171 = dma.hbm_to_vmem [thread:$0]  (!%p4302_p6), %s5124_s10, 1024, %s683_s29, [#allocation19], %s5122_s9, %s5122_s9, %s5121_s7  }
 0x18f   : > { %s5125_s12 = sld [smem:[#allocation65_spill]] }
 0x195   : > { %s3815_s26 = scalar_lea.hbm %s5125_s12, 1024 }
 0x196   : > { %p3816_p1 = scmp.ne.s32.totalorder %s5125_s12, %s3815_s26  ;;  %p3822_p12 = scmp.lt.u32.totalorder %s3815_s26, %s5125_s12 }
 0x198   : > { %p3818_p3 = pnand %p3816_p1, %p4318_p8 }
 0x19a   : > { %p3819_p11 = pneg %p3818_p3 }
 0x19c   : > { %p3824_p13 = pnand %p3822_p12, %p3819_p11 }
 0x19e   : > { %3827 = shalt.err (!%p3824_p13)
}
 0x19f   : > { %s3828_s29 = scalar_lea.vmem %s4558_s18, 1024  ;;  %p3836_p7 = scmp.lt.s32.totalorder %s4558_s18, %s4558_s18 }
 0x1a0   : > { %p3829_p0 = scmp.ne.s32.totalorder %s4558_s18, %s3828_s29  ;;  %p3837_p9 = scmp.lt.s32.totalorder %s3828_s29, %s3828_s29 }
 0x1a2   : > { %p3831_p2 = pnand %p3829_p0, %p4318_p8  ;;  %p3838_p5 = por %p3837_p9, %p3836_p7 }
 0x1a4   : > { %p3832_p4 = pneg %p3831_p2 }
 0x1a6   : > { %p3839_p10 = pnand %p3838_p5, %p3832_p4 }
 0x1a8   : > { %3842 = shalt.err (!%p3839_p10)
}
 0x1a9   : > { %3177 = dma.hbm_to_vmem [thread:$0]  (!%p4302_p6), %s5125_s12, 1024, %s4558_s18, [#allocation22], %s5122_s9, %s5122_s9, %s5121_s7  }
 0x1aa   : > { %s4129_s19 = smov [#allocation26]   ;;  %s4130_s25 = smov [#allocation29]  }
 0x1ab   : > { %s730_s28 = sshll.u32 %s4129_s19, 4  ;;  %s754_s26 = sshll.u32 %s4130_s25, 4  ;;  %s731_s28 = int_to_ptr.vmem [resolvable:$true] %s730_s28  ;;  %s4607_s26 = int_to_ptr.vmem [resolvable:$true] %s754_s26 }
 0x1ac   : > { %s5126_s14 = sld [smem:[#allocation67_spill]] }
 0x1b2   : > { %s3843_s4 = scalar_lea.hbm %s5126_s14, 1024 }
 0x1b3   : > { %p3844_p1 = scmp.ne.s32.totalorder %s5126_s14, %s3843_s4  ;;  %p3850_p12 = scmp.lt.u32.totalorder %s3843_s4, %s5126_s14 }
 0x1b5   : > { %p3846_p3 = pnand %p3844_p1, %p4318_p8 }
 0x1b7   : > { %p3847_p11 = pneg %p3846_p3 }
 0x1b9   : > { %p3852_p13 = pnand %p3850_p12, %p3847_p11 }
 0x1bb   : > { %3855 = shalt.err (!%p3852_p13)
}
 0x1bc   : > { %s3856_s27 = scalar_lea.vmem %s731_s28, 1024  ;;  %p3864_p7 = scmp.lt.s32.totalorder %s731_s28, %s731_s28 }
 0x1bd   : > { %p3857_p0 = scmp.ne.s32.totalorder %s731_s28, %s3856_s27  ;;  %p3865_p9 = scmp.lt.s32.totalorder %s3856_s27, %s3856_s27 }
 0x1bf   : > { %p3859_p2 = pnand %p3857_p0, %p4318_p8  ;;  %p3866_p5 = por %p3865_p9, %p3864_p7 }
 0x1c1   : > { %p3860_p4 = pneg %p3859_p2 }
 0x1c3   : > { %p3867_p10 = pnand %p3866_p5, %p3860_p4 }
 0x1c5   : > { %3870 = shalt.err (!%p3867_p10)
}
 0x1c6   : > { %3183 = dma.hbm_to_vmem [thread:$0]  (!%p4302_p6), %s5126_s14, 1024, %s731_s28, [#allocation25], %s5122_s9, %s5122_s9, %s5121_s7  }
 0x1c7   : > { %s3871_s4 = scalar_lea.hbm %s5049_s16, 1024 }
 0x1c8   : > { %p3872_p1 = scmp.ne.s32.totalorder %s5049_s16, %s3871_s4  ;;  %p3878_p12 = scmp.lt.u32.totalorder %s3871_s4, %s5049_s16 }
 0x1ca   : > { %p3874_p3 = pnand %p3872_p1, %p4318_p8 }
 0x1cc   : > { %p3875_p11 = pneg %p3874_p3 }
 0x1ce   : > { %p3880_p13 = pnand %p3878_p12, %p3875_p11 }
 0x1d0   : > { %3883 = shalt.err (!%p3880_p13)
}
 0x1d1   : > { %s3884_s28 = scalar_lea.vmem %s4607_s26, 1024  ;;  %p3892_p7 = scmp.lt.s32.totalorder %s4607_s26, %s4607_s26 }
 0x1d2   : > { %p3885_p0 = scmp.ne.s32.totalorder %s4607_s26, %s3884_s28  ;;  %p3893_p9 = scmp.lt.s32.totalorder %s3884_s28, %s3884_s28 }
 0x1d4   : > { %p3887_p2 = pnand %p3885_p0, %p4318_p8  ;;  %p3894_p5 = por %p3893_p9, %p3892_p7 }
 0x1d6   : > { %p3888_p4 = pneg %p3887_p2 }
 0x1d8   : > { %p3895_p10 = pnand %p3894_p5, %p3888_p4 }
 0x1da   : > { %3898 = shalt.err (!%p3895_p10)
}
 0x1db   : > { %3189 = dma.hbm_to_vmem [thread:$0]  (!%p4302_p6), %s5049_s16, 1024, %s4607_s26, [#allocation28], %s5122_s9, %s5122_s9, %s5121_s7  }
 0x1dc   : > { %s4131_s25 = smov [#allocation32]   ;;  %s3899_s22 = scalar_lea.hbm %s5053_s20, 4096 }
 0x1dd   : > { %s787_s30 = sshll.u32 %s4131_s25, 4  ;;  %p3900_p1 = scmp.ne.s32.totalorder %s5053_s20, %s3899_s22  ;;  %s788_s30 = int_to_ptr.vmem [resolvable:$true] %s787_s30 }
 0x1de   : > { %p3906_p12 = scmp.lt.u32.totalorder %s3899_s22, %s5053_s20 }
 0x1df   : > { %p3902_p3 = pnand %p3900_p1, %p4318_p8 }
 0x1e1   : > { %p3903_p11 = pneg %p3902_p3 }
 0x1e3   : > { %p3908_p13 = pnand %p3906_p12, %p3903_p11 }
 0x1e5   : > { %3911 = shalt.err (!%p3908_p13)
}
 0x1e6   : > { %s3912_s7 = scalar_lea.vmem %s788_s30, 4096  ;;  %p3920_p7 = scmp.lt.s32.totalorder %s788_s30, %s788_s30 }
 0x1e7   : > { %p3913_p0 = scmp.ne.s32.totalorder %s788_s30, %s3912_s7  ;;  %p3921_p9 = scmp.lt.s32.totalorder %s3912_s7, %s3912_s7 }
 0x1e9   : > { %p3915_p2 = pnand %p3913_p0, %p4318_p8  ;;  %p3922_p5 = por %p3921_p9, %p3920_p7 }
 0x1eb   : > { %p3916_p4 = pneg %p3915_p2 }
 0x1ed   : > { %p3923_p10 = pnand %p3922_p5, %p3916_p4 }
 0x1ef   : > { %3926 = shalt.err (!%p3923_p10)
}
 0x1f0   : > { %s4132_s9 = smov 256   ;;  %s5127_s26 = sld [smem:[#allocation50_spill]] }
 0x1f1   : > { %s5128_s27 = sld [smem:[#allocation48_spill]]  ;;  %s5129_s19 = sld [smem:[#allocation47_spill]] }
 0x1f2   : > { %s5130_s25 = sld [smem:[#allocation46_spill]]  ;;  %s5131_s5 = sld [smem:[#allocation51_spill]] }
 0x1f3   : > { %s4133_s1 = smov 16   ;;  %s2685_s29 = sadd.s32 4294967294, %s4109_s0  }
 0x1f4   : > { %3195 = dma.hbm_to_vmem [thread:$0]  (!%p4302_p6), %s5053_s20, 4096, %s788_s30, [#allocation31], %s4132_s9, %s4132_s9, %s4133_s1  }
 0x1f5   : > { %p76_p3 = scmp.eq.s32.totalorder %s4109_s0, 0  ;;  %p569_p4 = scmp.eq.s32.totalorder %s2685_s29, 1 }
 0x1f6   : > { %s61_s3 = sadd.s32 1, %s5127_s26  ;;  %p3224_p9 = scmp.lt.s32.totalorder %s4109_s0, 2 }
 0x1f7   : > { %s68_s18 = sadd.s32 1, %s5128_s27  ;;  %p63_p8 = scmp.ge.s32.totalorder %s61_s3, 2 }
 0x1f8   : > { %p75_p1 = scmp.ne.s32.totalorder %s5128_s27, %s5129_s19  ;;  %p81_p11 = scmp.ne.s32.totalorder %s5129_s19, %s5130_s25 }
 0x1f9   : > { %s5181_s3 = smov (%p63_p8, %s61_s3), 0  ;;  %p5133_p13 = scmp.eq.s32.totalorder %s5131_s5, 0 }
 0x1fa   : > { %p4684_p12 = por %p76_p3, %p75_p1  ;;  %s65_s28 = ssub.s32 %s5127_s26, %s5181_s3 }
 0x1fb   : > { %p4690_p6 = por %p5133_p13, %p81_p11  ;;  %p563_p0 = scmp.eq.s32.totalorder %s5131_s5, 1 }
 0x1fc   : > { %p66_p2 = scmp.eq.s32.totalorder %s65_s28, 0  ;;  %p4705_p5 = por %p569_p4, %p81_p11 }
 0x1fd   : > { %s5134_s30 = scalar_select %p4690_p6, 1, 0 }
 0x1fe   : > { %p4697_p7 = por %p563_p0, %p75_p1  ;;  %s809_s25 = sand.u32 1, %s5128_s27  }
 0x1ff   : > { %s4703_s9 = scalar_select %p66_p2, %s5128_s27, %s68_s18  }
 0x200   : > { %s5135_s7 = scalar_select %p4697_p7, 1, 0 }
 0x201   : > { %s5136_s19 = scalar_select %p4705_p5, 1, 0 }
 0x202   : > { %s4710_s1 = sshll.u32 %s809_s25, 3  ;;  %s2707_s4 = sshll.u32 %s5127_s26, 7 }
 0x203   : > { %s5137_s28 = sld [smem:[#allocation53_spill]]  ;;  %s813_s8 = scalar_lea.vmem [#allocation3], %s4710_s1 }
 0x204   : > { %s820_s18 = sshll.u32 %s813_s8, 4  ;;  %p4723_p10 = pnand %p3224_p9, %p4684_p12  ;;  %s4719_s18 = int_to_ptr.vmem [resolvable:$true] %s820_s18 }
 0x205   : > { %s5140_s11 = sld [smem:[#allocation54_spill]]  ;;  %s827_s22 = sand.u32 1, %s4109_s0  }
 0x206   : > { %p3929_p1 = pneg %p4723_p10 }
 0x209   : > { %s5138_s2 = smov %s5137_s28  ;;  %s4716_s29 = scalar_lea.hbm %s5137_s28, %s2707_s4 }
 0x20a   : > { %s810_s28 = scalar_lea.sflag [#allocation4], %s809_s25  ;;  %s3927_s12 = scalar_lea.hbm %s4716_s29, 128 }
 0x20b   : > { %s4730_s5 = scalar_lea.hbm %s5140_s11, %s2707_s4  ;;  %p3928_p8 = scmp.ne.s32.totalorder %s4716_s29, %s3927_s12 }
 0x20c   : > { %s3932_s13 = scalar_lea.hbm %s5138_s2, 256  ;;  %p3933_p12 = scmp.lt.u32.totalorder %s4716_s29, %s5138_s2 }
 0x20d   : > { %p3930_p3 = pnand %p3929_p1, %p3928_p8  ;;  %p3934_p13 = scmp.lt.u32.totalorder %s3932_s13, %s3927_s12 }
 0x20e   : > { %p3936_p2 = scmp.lt.u32.totalorder %s3927_s12, %s4716_s29 }
 0x20f   : > { %p3931_p11 = pneg %p3930_p3  ;;  %p3935_p0 = por %p3934_p13, %p3933_p12 }
 0x211   : > { %p3937_p4 = por %p3936_p2, %p3935_p0 }
 0x213   : > { %p3938_p9 = pnand %p3937_p4, %p3931_p11 }
 0x215   : > { %3941 = shalt.err (!%p3938_p9)
}
 0x216   : > { %s3942_s25 = scalar_lea.vmem %s4719_s18, 128  ;;  %s4134_s4 = smov [#allocation3]  }
 0x217   : > { %p3943_p8 = scmp.ne.s32.totalorder %s4719_s18, %s3942_s25  ;;  %s3947_s26 = sshll.u32 %s4134_s4, 4  ;;  %s3948_s26 = int_to_ptr.vmem [resolvable:$false] %s3947_s26 }
 0x218   : > { %s3949_s14 = scalar_lea.vmem %s3948_s26, 256  ;;  %p3950_p7 = scmp.lt.s32.totalorder %s4719_s18, %s3948_s26 }
 0x219   : > { %p3945_p3 = pnand %p3943_p8, %p3929_p1  ;;  %p3951_p12 = scmp.lt.s32.totalorder %s3949_s14, %s3942_s25 }
 0x21b   : > { %p3946_p5 = pneg %p3945_p3  ;;  %p3952_p13 = por %p3951_p12, %p3950_p7 }
 0x21d   : > { %p3953_p0 = pnand %p3952_p13, %p3946_p5 }
 0x21f   : > { %3956 = shalt.err (!%p3953_p0)
}
 0x220   : > { %3199 = dma.hbm_to_vmem [thread:$0]  (!%p4723_p10), %s4716_s29, 128, %s4719_s18, %s810_s28  }
 0x221   : > { %s831_s12 = scalar_lea.vmem [#allocation6], %s4710_s1  ;;  %s828_s8 = scalar_lea.sflag [#allocation7], %s827_s22 }
 0x222   : > { %s838_s13 = sshll.u32 %s831_s12, 4  ;;  %s3957_s6 = scalar_lea.hbm %s4730_s5, 128  ;;  %s839_s13 = int_to_ptr.vmem [resolvable:$true] %s838_s13 }
 0x223   : > { %p3958_p7 = scmp.ne.s32.totalorder %s4730_s5, %s3957_s6  ;;  %s3962_s4 = scalar_lea.hbm %s5140_s11, 256 }
 0x224   : > { %p3963_p2 = scmp.lt.u32.totalorder %s4730_s5, %s5140_s11  ;;  %p3964_p4 = scmp.lt.u32.totalorder %s3962_s4, %s3957_s6 }
 0x225   : > { %p3960_p5 = pnand %p3958_p7, %p3929_p1  ;;  %p3966_p8 = scmp.lt.u32.totalorder %s3957_s6, %s4730_s5 }
 0x226   : > { %p3965_p9 = por %p3964_p4, %p3963_p2 }
 0x227   : > { %p3961_p11 = pneg %p3960_p5 }
 0x228   : > { %p3967_p3 = por %p3966_p8, %p3965_p9 }
 0x22a   : > { %p3968_p12 = pnand %p3967_p3, %p3961_p11 }
 0x22c   : > { %3971 = shalt.err (!%p3968_p12)
}
 0x22d   : > { %s3972_s1 = scalar_lea.vmem %s839_s13, 128  ;;  %s4135_s29 = smov [#allocation6]  }
 0x22e   : > { %p3973_p13 = scmp.ne.s32.totalorder %s839_s13, %s3972_s1  ;;  %s3977_s18 = sshll.u32 %s4135_s29, 4  ;;  %s3978_s18 = int_to_ptr.vmem [resolvable:$false] %s3977_s18 }
 0x22f   : > { %s3979_s22 = scalar_lea.vmem %s3978_s18, 256  ;;  %p3980_p5 = scmp.lt.s32.totalorder %s839_s13, %s3978_s18 }
 0x230   : > { %p3975_p0 = pnand %p3973_p13, %p3929_p1  ;;  %p3981_p6 = scmp.lt.s32.totalorder %s3979_s22, %s3972_s1 }
 0x232   : > { %p3976_p7 = pneg %p3975_p0  ;;  %p3982_p2 = por %p3981_p6, %p3980_p5 }
 0x234   : > { %p3983_p4 = pnand %p3982_p2, %p3976_p7 }
 0x236   : > { %3986 = shalt.err (!%p3983_p4)
}
 0x237   : > { %3202 = dma.hbm_to_vmem [thread:$0]  (!%p4723_p10), %s4730_s5, 128, %s839_s13, %s828_s8  }
 0x238   : > { %s5141_s28 = sld [smem:[#allocation52_spill]] }
 0x23e   : > { %p5142_p11 = scmp.ne.s32.totalorder %s5141_s28, 0 }
 0x23f   : > { %s5143_s12 = sld [smem:[#allocation47_spill]] (!%p5142_p11)  ;;  %p5144_p6 = scmp.ne.s32.totalorder (!%p5142_p11), %s5134_s30, 0 }
 0x240   : > { %847 = sbr.rel (%p5142_p11) target bundleno = 3469 (0xd8d), region = 108 }
 0x245   : > { %s4783_s6 = sand.u32 (!%p5142_p11), 1, %s5143_s12  }
 0x246   : > { %s2711_s10 = sshll.u32 (!%p5142_p11), %s4783_s6, 3  ;;  %s850_s25 = scalar_lea.sflag (!%p5142_p11), [#allocation4], %s4783_s6 }
 0x247   : > { %s4787_s4 = scalar_lea.vmem [#allocation3], %s2711_s10 }
 0x248   : > { %4040 = dma.done.wait (%p5144_p6), %s850_s25, 128  }
 0x249   : > { %4042 = vsyncadd (%p5144_p6), %s850_s25, 4294967168  ;;  %s5145_s27 = sld [smem:[#allocation51_spill]]  ;;  %s4794_s8 = scalar_lea.vmem [#allocation6], %s2711_s10 }
 0x24f   : > { %s858_s5 = sand.u32 1, %s5145_s27  }
 0x250   : > { %s859_s13 = scalar_lea.sflag [#allocation7], %s858_s5 }
 0x251   : > { %4044 = dma.done.wait (%p5144_p6), %s859_s13, 128  }
 0x252   : > { %4046 = vsyncadd (%p5144_p6), %s859_s13, 4294967168  ;;  %p5146_p10 = scmp.eq.s32.totalorder %s5145_s27, 0 }
 0x254   : > { %4048 = dma.done.wait (%p5146_p10), [#allocation7], 1024   ;;  %p5147_p1 = pmov %p5146_p10 }
 0x256   : > { %4050 = vsyncadd (%p5147_p1), [#allocation7], 4294966272  ;;  %p5148_p9 = pmov %p5147_p1 }
 0x257   : > { %p5149_p8 = pmov %p5147_p1 }
 0x258   : > { %4052 = dma.done.wait (%p5148_p9), [#allocation10], 2064  }
 0x259   : > { %4054 = vsyncadd (%p5149_p8), [#allocation10], 4294965232  ;;  %p5150_p3 = pmov %p5147_p1 }
 0x25a   : > { %p5151_p12 = pmov %p5147_p1 }
 0x25b   : > { %4056 = dma.done.wait (%p5150_p3), [#allocation13], 1056  }
 0x25c   : > { %4058 = vsyncadd (%p5151_p12), [#allocation13], 4294966240  ;;  %p5152_p13 = pmov %p5147_p1 }
 0x25d   : > { %p5153_p0 = pmov %p5147_p1 }
 0x25e   : > { %4060 = dma.done.wait (%p5152_p13), [#allocation16], 32  }
 0x25f   : > { %4062 = vsyncadd (%p5153_p0), [#allocation16], 4294967264  ;;  %p5154_p7 = pmov %p5153_p0 }
 0x260   : > { %p5155_p5 = pmov %p5153_p0 }
 0x261   : > { %4064 = dma.done.wait (%p5154_p7), [#allocation19], 1040  }
 0x262   : > { %4066 = vsyncadd (%p5155_p5), [#allocation19], 4294966256  ;;  %p5156_p2 = pmov %p5153_p0 }
 0x263   : > { %p5157_p4 = pmov %p5153_p0 }
 0x264   : > { %4068 = dma.done.wait (%p5156_p2), [#allocation22], 1040  }
 0x265   : > { %4070 = vsyncadd (%p5157_p4), [#allocation22], 4294966256  ;;  %p5158_p11 = pmov %p5153_p0 }
 0x266   : > { %p5159_p6 = pmov %p5153_p0 }
 0x267   : > { %4072 = dma.done.wait (%p5158_p11), [#allocation25], 1040  }
 0x268   : > { %4074 = vsyncadd (%p5159_p6), [#allocation25], 4294966256  ;;  %p5160_p10 = pmov %p5153_p0 }
 0x269   : > { %p5161_p1 = pmov %p5153_p0 }
 0x26a   : > { %4076 = dma.done.wait (%p5160_p10), [#allocation28], 1040  }
 0x26b   : > { %4078 = vsyncadd (%p5161_p1), [#allocation28], 4294966256  ;;  %p5162_p9 = pmov %p5153_p0 }
 0x26c   : > { %p5163_p8 = pmov %p5153_p0 }
 0x26d   : > { %4080 = dma.done.wait (%p5162_p9), [#allocation31], 4112  }
 0x26e   : > { %4082 = vsyncadd (%p5163_p8), [#allocation31], 4294963184  ;;  %v4136_v0 = vmov 0.0   ;;  %v4137_v1 = vmov 0   ;;  %vm4138_vm0 = vmmov 0   ;;  %v3323_v6 = vld [vmem:[#allocation8] sm:$0xff]   ;;  %v1145_v30 = vlaneseq }
 0x26f   : > { %2918 = vmatprep.subr.bf16.mxu0 %v4136_v0  ;;  %1267 = vmatprep.mubr.bf16.mxu1 %v4137_v1  ;;  %v3317_v2 = vld [vmem:[#allocation11 + $0x4] ss:$8 sps:$4 sm:$0xff]   ;;  %v3319_v3 = vld [vmem:[#allocation11] ss:$8 sps:$4 sm:$0xff]   ;;  %v3320_v4 = vld [vmem:[#allocation11 + $0x14] ss:$8 sps:$4 sm:$0xff]  }
 0x270   : > { %2934 = vmatprep.mubr.msk.bf16.mxu0 %vm4138_vm0, %v4136_v0  ;;  %1235 = vmatprep.subr.bf16.mxu1 %v3317_v2  ;;  %v3322_v5 = vld [vmem:[#allocation11 + $0x10] ss:$8 sps:$4 sm:$0xff]   ;;  %v3324_v7 = vld [vmem:[#allocation11 + $0x24] ss:$8 sps:$4 sm:$0xff]   ;;  %v3326_v9 = vld [vmem:[#allocation11 + $0x20] ss:$8 sps:$4 sm:$0xff]  }
 0x271   : > { %1236 = vmatpush1.bf16.msra.mxu1 %v3319_v3  ;;  %2919 = vmatpush3.bf16.msra.mxu0 %v3323_v6  ;;  %v3327_v8 = vld [vmem:[#allocation8 + $0x8] sm:$0xff]   ;;  %v3328_v10 = vld [vmem:[#allocation11 + $0x34] ss:$8 sps:$4 sm:$0xff]   ;;  %v3330_v12 = vld [vmem:[#allocation11 + $0x30] ss:$8 sps:$4 sm:$0xff]   ;;  %v4859_v31 = vshrl.u32 %v1145_v30, 7 }
 0x272   : > { %1237 = vmatprep.subr.bf16.mxu1 %v3320_v4  ;;  %2920 = vmatprep.subr.bf16.mxu0 %v4136_v0  ;;  %v3331_v11 = vld [vmem:[#allocation8 + $0x10] sm:$0xff]   ;;  %v3335_v14 = vld [vmem:[#allocation8 + $0x18] sm:$0xff]   ;;  %v3334_v15 = vld [vmem:[#allocation11 + $0x40] ss:$8 sps:$4 sm:$0xff]   ;;  %vm1336_vm1 = vcmask 1043456   ;;  %vm1319_vm2 = vcmask 64512  }
 0x273   : > { %v3332_v13 = vld [vmem:[#allocation11 + $0x44] ss:$8 sps:$4 sm:$0xff]   ;;  %v3336_v16 = vld [vmem:[#allocation11 + $0x54] ss:$8 sps:$4 sm:$0xff]   ;;  %v3338_v18 = vld [vmem:[#allocation11 + $0x50] ss:$8 sps:$4 sm:$0xff]  }
 0x274   : > { %v3339_v17 = vld [vmem:[#allocation8 + $0x20] sm:$0xff]   ;;  %v3343_v20 = vld [vmem:[#allocation8 + $0x28] sm:$0xff]   ;;  %v3347_v23 = vld [vmem:[#allocation8 + $0x30] sm:$0xff]   ;;  %v1147_v32 = vsub.s32 0, %v4859_v31  ;;  %v1151_v34 = vsub.s32 1, %v4859_v31  ;;  %s5164_s14 = sld [smem:[#allocation68_spill]] }
 0x275   : > { %1238 = vmatpush1.bf16.msra.mxu1 %v3322_v5  ;;  %2921 = vmatpush3.bf16.msra.mxu0 %v3327_v8  ;;  %v3340_v19 = vld [vmem:[#allocation11 + $0x64] ss:$8 sps:$4 sm:$0xff]   ;;  %v3342_v21 = vld [vmem:[#allocation11 + $0x60] ss:$8 sps:$4 sm:$0xff]   ;;  %v3344_v22 = vld [vmem:[#allocation11 + $0x74] ss:$8 sps:$4 sm:$0xff]  }
 0x276   : > { %1239 = vmatprep.subr.bf16.mxu1 %v3324_v7  ;;  %2922 = vmatprep.subr.bf16.mxu0 %v4136_v0  ;;  %v3346_v24 = vld [vmem:[#allocation11 + $0x70] ss:$8 sps:$4 sm:$0xff]   ;;  %v4848_v27 = vld [vmem:[%s4787_s4] sm:$0xff]  ;;  %s5165_s29 = sld [smem:[#allocation69_spill]]  ;;  %s5166_s18 = sld [smem:[#allocation49_spill]] }
 0x277   : > { %v1014_v25 = vld [vmem:[%s4794_s8] sm:$0xff]  ;;  %v1013_v29 = vpack.c.bf16 %v4848_v27, %v4848_v27  ;;  %v1143_v33 = vld [vmem:[#allocation12] sm:$0x3]  ;;  %v2731_v40 = vld [vmem:[#allocation9] ss:$0 sm:$0xff]  ;;  %s2730_s22 = sshll.u32 %s4783_s6, 5 }
 0x278   : > { %v3348_v26 = vld [vmem:[#allocation8 + $0x38] sm:$0xff]   ;;  %v1015_v28 = vpack.c.bf16 %v1014_v25, %v1014_v25  ;;  %v1148_v35 = vrot.slane %v1143_v33, %v1147_v32  ;;  %v1152_v36 = vrot.slane %v1143_v33, %v1151_v34  ;;  %v3349_v2 = vld [vmem:[#allocation14] sm:$0xff]   ;;  %v3350_v3 = vld [vmem:[#allocation14 + $0x8] sm:$0xff]   ;;  %s5167_s10 = sld [smem:[#allocation70_spill]]  ;;  %s999_s4 = scalar_lea.vmem [#allocation33], %s2730_s22 }
 0x279   : > { %1240 = vmatpush1.bf16.msra.mxu1 %v3326_v9  ;;  %2923 = vmatpush3.bf16.msra.mxu0 %v3331_v11  ;;  %v3351_v4 = vld [vmem:[#allocation14 + $0x10] sm:$0xff]   ;;  %v3352_v5 = vld [vmem:[#allocation14 + $0x18] sm:$0xff]   ;;  %v3353_v6 = vld [vmem:[#allocation14 + $0x20] sm:$0xff]   ;;  %s2405_s27 = sshll.u32 %s999_s4, 4  ;;  %s5168_s8 = sld [smem:[#allocation71_spill]]  ;;  %s4986_s27 = int_to_ptr.vmem [resolvable:$true] %s2405_s27 }
 0x27a   : > { %1241 = vmatprep.subr.bf16.mxu1 %v3328_v10  ;;  %2924 = vmatprep.subr.bf16.mxu0 %v4136_v0  ;;  %v3354_v7 = vld [vmem:[#allocation14 + $0x28] sm:$0xff]   ;;  %v3355_v8 = vld [vmem:[#allocation14 + $0x30] sm:$0xff]   ;;  %s2389_s26 = scalar_lea.sflag [#allocation5], %s4783_s6  ;;  %s3987_s1 = scalar_lea.vmem %s4986_s27, 512 }
 0x27b   : > { %p3988_p3 = scmp.ne.s32.totalorder %s4986_s27, %s3987_s1  ;;  %p5169_p12 = scmp.ne.s32.totalorder %s5135_s7, 0 }
 0x27c   : > { %s2850_s25 = sshll.u32 %s5166_s18, 9 }
 0x27d   : > { %1242 = vmatpush1.bf16.msra.mxu1 %v3330_v12  ;;  %2925 = vmatpush3.bf16.msra.mxu0 %v3335_v14  ;;  %p3989_p13 = pnand %p3988_p3, %p5169_p12 }
 0x27e   : > { %1243 = vmatprep.subr.bf16.mxu1 %v3332_v13  ;;  %2926 = vmatprep.subr.bf16.mxu0 %v4136_v0  ;;  %v3356_v13 = vld [vmem:[#allocation14 + $0x38] sm:$0xff]  }
 0x27f   : > { %s4984_s30 = scalar_lea.hbm %s5168_s8, %s2850_s25  ;;  %p3990_p0 = pneg %p3989_p13 }
 0x281   : > { %1244 = vmatpush1.bf16.msra.mxu1 %v3334_v15  ;;  %2927 = vmatpush3.bf16.msra.mxu0 %v3339_v17 }
 0x282   : > { %1245 = vmatprep.subr.bf16.mxu1 %v3336_v16  ;;  %2928 = vmatprep.subr.bf16.mxu0 %v4136_v0 }
 0x285   : > { %1246 = vmatpush1.bf16.msra.mxu1 %v3338_v18  ;;  %2929 = vmatpush3.bf16.msra.mxu0 %v3343_v20 }
 0x286   : > { %1247 = vmatprep.subr.bf16.mxu1 %v3340_v19  ;;  %2930 = vmatprep.subr.bf16.mxu0 %v4136_v0  ;;  %v2757_v19 = vld [vmem:[#allocation15] ss:$0 sm:$0xff] }
 0x289   : > { %1248 = vmatpush1.bf16.msra.mxu1 %v3342_v21  ;;  %2931 = vmatpush3.bf16.msra.mxu0 %v3347_v23 }
 0x28a   : > { %1249 = vmatprep.subr.bf16.mxu1 %v3344_v22  ;;  %2932 = vmatprep.subr.bf16.mxu0 %v4136_v0 }
 0x28d   : > { %1250 = vmatpush1.bf16.msra.mxu1 %v3346_v24  ;;  %2933 = vmatpush3.bf16.msra.mxu0 %v3348_v26  ;;  %v3357_v26 = vld [vmem:[#allocation20] sm:$0xff]  }
 0x28e   : > { %2944 = vmatprep.subr.bf16.mxu1 %v4136_v0  ;;  %2938 = vmatprep.subr.bf16.mxu0 %v4136_v0 }
 0x290   : > { %1268 = vmatmul.mubr.bf16.vlgmr.msra.gmra.mrb[0].mxu1 %v1015_v28  ;;  %2935 = vmatmul.mubr.bf16.vlgmr.msra.gmra.mrb[0].mxu0 %v1013_v29  ;;  %v3358_v28 = vld [vmem:[#allocation20 + $0x8] sm:$0xff]  }
 0x291   : > { %2946 = vmatprep.mubr.msk.bf16.mxu1 %vm4138_vm0, %v4136_v0  ;;  %2940 = vmatprep.mubr.msk.bf16.mxu0 %vm4138_vm0, %v4136_v0 }
 0x363   : > { %v1269_v37 = vpop.f32.mrb[0].mxu1  ;;  %v1121_v43 = vpop.f32.mrb[0].mxu0 }
 0x364   : > { %v1270_v38 = vadd.f32 %v1269_v37, %v1148_v35  ;;  %v1271_v39 = vpop.f32.mrb[1].mxu1  ;;  %v2936_v46 = vpop.f32.mrb[1].mxu0  ;;  %v1122_v48 = vadd.f32 %v2731_v40, %v1121_v43  ;;  %v3360_v37 = vld [vmem:[#allocation20 + $0x18] sm:$0xff]  }
 0x365   : > { %v1272_v41 = vadd.f32 %v1271_v39, %v1152_v36  ;;  %v1273_v42 = vpop.f32.mrb[2].mxu1  ;;  %v1124_v49 = vpop.f32.mrb[2].mxu0  ;;  %v3359_v36 = vld [vmem:[#allocation20 + $0x10] sm:$0xff]   ;;  %v3364_v40 = vld [vmem:[#allocation20 + $0x38] sm:$0xff]  }
 0x366   : > { %v1277_v44 = vpack.c.bf16 %v1270_v38, %v1270_v38  ;;  %v1274_v45 = vpop.f32.mrb[3].mxu1  ;;  %v2937_v50 = vpop.f32.mrb[3].mxu0  ;;  %v1276_v52 = vpack.c.bf16 %v1122_v48, %v1122_v48  ;;  %v3362_v38 = vld [vmem:[#allocation20 + $0x28] sm:$0xff]   ;;  %v3363_v39 = vld [vmem:[#allocation20 + $0x30] sm:$0xff]  }
 0x367   : > { %v1332_v47 = vpack.c.bf16 %v1272_v41, %v1272_v41  ;;  %v3365_v41 = vld [vmem:[#allocation23] sm:$0xff]   ;;  %v3366_v42 = vld [vmem:[#allocation23 + $0x8] sm:$0xff]   ;;  %v3367_v43 = vld [vmem:[#allocation23 + $0x10] sm:$0xff]  }
 0x368   : > { %2939 = vmatpush3.bf16.xpose.msra.mxu0 %v1277_v44  ;;  %v3368_v44 = vld [vmem:[#allocation23 + $0x18] sm:$0xff]   ;;  %v3369_v45 = vld [vmem:[#allocation23 + $0x20] sm:$0xff]   ;;  %v3370_v46 = vld [vmem:[#allocation23 + $0x28] sm:$0xff]  }
 0x369   : > { %v1338_v51 = vsel %vm1336_vm1, %v1332_v47, 0  ;;  %2950 = vmatprep.subr.bf16.mxu0 %v4136_v0 }
 0x36a   : > { %2945 = vmatpush3.bf16.msra.mxu1 %v1338_v51  ;;  %v2766_v51 = vld [vmem:[#allocation17] ss:$0 sm:$0xff] }
 0x36b   : > { %2970 = vmatprep.subr.bf16.mxu1 %v4136_v0 }
 0x36f   : > { %2941 = vmatmul.mubr.bf16.vlgmr.msra.gmra.mrb[4].mxu0 %v1276_v52 }
 0x370   : > { %2966 = vmatprep.mubr.msk.bf16.mxu0 %vm4138_vm0, %v4136_v0  ;;  %2951 = vmatpush3.bf16.msra.mxu0 %v3349_v2  ;;  %v3378_v2 = vld [vmem:[#allocation26 + $0x28] sm:$0xff]  }
 0x371   : > { %2952 = vmatprep.subr.bf16.mxu0 %v4136_v0 }
 0x374   : > { %2953 = vmatpush3.bf16.msra.mxu0 %v3350_v3  ;;  %v2768_v3 = vld [vmem:[#allocation21] ss:$0 sm:$0xff] }
 0x375   : > { %2954 = vmatprep.subr.bf16.mxu0 %v4136_v0 }
 0x378   : > { %2955 = vmatpush3.bf16.msra.mxu0 %v3351_v4 }
 0x379   : > { %2956 = vmatprep.subr.bf16.mxu0 %v4136_v0 }
 0x37c   : > { %2957 = vmatpush3.bf16.msra.mxu0 %v3352_v5 }
 0x37d   : > { %2958 = vmatprep.subr.bf16.mxu0 %v4136_v0 }
 0x380   : > { %2959 = vmatpush3.bf16.msra.mxu0 %v3353_v6 }
 0x381   : > { %2960 = vmatprep.subr.bf16.mxu0 %v4136_v0 }
 0x384   : > { %2961 = vmatpush3.bf16.msra.mxu0 %v3354_v7 }
 0x385   : > { %2962 = vmatprep.subr.bf16.mxu0 %v4136_v0 }
 0x388   : > { %2963 = vmatpush3.bf16.msra.mxu0 %v3355_v8 }
 0x389   : > { %2964 = vmatprep.subr.bf16.mxu0 %v4136_v0 }
 0x38c   : > { %2965 = vmatpush3.bf16.msra.mxu0 %v3356_v13  ;;  %v3381_v13 = vld [vmem:[#allocation29] sm:$0xff]  }
 0x38d   : > { %2990 = vmatprep.subr.bf16.mxu0 %v4136_v0 }
 0x442   : > { %v1312_v53 = vpop.f32.mrb[4].mxu0 }
 0x443   : > { %v1318_v54 = vmul.f32 0.088388346, %v1312_v53  ;;  %v2942_v55 = vpop.f32.mrb[5].mxu0  ;;  %v2767_v53 = vld [vmem:[#allocation18] ss:$0 sm:$0xff] }
 0x444   : > { %v1315_v56 = vpop.f32.mrb[6].mxu0 }
 0x445   : > { %v2943_v57 = vpop.f32.mrb[7].mxu0  ;;  %v1320_v58 = vsel %vm1319_vm2, %v1318_v54, -inf }
 0x446   : > { %1321 = vmax.xlane.f32.xlu0 %v1320_v58  ;;  %v3371_v57 = vld [vmem:[#allocation23 + $0x30] sm:$0xff]   ;;  %v3372_v58 = vld [vmem:[#allocation23 + $0x38] sm:$0xff]  }
 0x4d3   : > { %v1322_v59 = vpop.xlane.xlu0 %1321 }
 0x4d4   : > { %v1323_v60 = vsub.f32 %v1318_v54, %v1322_v59  ;;  %v3373_v59 = vld [vmem:[#allocation26] sm:$0xff]  }
 0x4d6   : > { %v1324_v61 = vmul.f32 1.442695, %v1323_v60  ;;  %v3374_v60 = vld [vmem:[#allocation26 + $0x8] sm:$0xff]  }
 0x4d8   : > { %3445 = vpow2.f32 %v1324_v61  ;;  %v3375_v61 = vld [vmem:[#allocation26 + $0x10] sm:$0xff]  }
 0x4e2   : > { %v3446_v62 = vpop.eup %3445 }
 0x4e3   : > { %v1326_v63 = vsel %vm1319_vm2, %v3446_v62, 0.0 }
 0x4e4   : > { %1327 = vadd.xlane.f32.xlu0 %v1326_v63  ;;  %v3377_v63 = vld [vmem:[#allocation26 + $0x20] sm:$0xff]  }
 0x571   : > { %v1328_v9 = vpop.xlane.xlu0 %1327 }
 0x572   : > { %3447 = vrcp.f32 %v1328_v9 }
 0x57c   : > { %v3448_v10 = vpop.eup %3447 }
 0x57d   : > { %v1330_v11 = vmul.f32 %v3448_v10, %v3446_v62  ;;  %v3376_v62 = vld [vmem:[#allocation26 + $0x18] sm:$0xff]  }
 0x57f   : > { %v1331_v12 = vpack.c.bf16 %v1330_v11, %v1330_v11  ;;  %v3379_v11 = vld [vmem:[#allocation26 + $0x30] sm:$0xff]  }
 0x581   : > { %2947 = vmatmul.mubr.msk.bf16.vlgmr.msra.gmra.mrb[4].mxu1 %vm1319_vm2, %v1331_v12  ;;  %v3380_v12 = vld [vmem:[#allocation26 + $0x38] sm:$0xff]  }
 0x582   : > { %2986 = vmatprep.mubr.msk.bf16.mxu1 %vm4138_vm0, %v4136_v0  ;;  %2971 = vmatpush3.bf16.msra.mxu1 %v3357_v26 }
 0x583   : > { %2972 = vmatprep.subr.bf16.mxu1 %v4136_v0 }
 0x586   : > { %2973 = vmatpush3.bf16.msra.mxu1 %v3358_v28 }
 0x587   : > { %2974 = vmatprep.subr.bf16.mxu1 %v4136_v0 }
 0x58a   : > { %2975 = vmatpush3.bf16.msra.mxu1 %v3359_v36  ;;  %v3392_v36 = vld [vmem:[%s5164_s14 + $0x18] sm:$0xff]  }
 0x58b   : > { %2976 = vmatprep.subr.bf16.mxu1 %v4136_v0 }
 0x58e   : > { %2977 = vmatpush3.bf16.msra.mxu1 %v3360_v37  ;;  %v3393_v37 = vld [vmem:[%s5164_s14 + $0x20] sm:$0xff]  }
 0x58f   : > { %2978 = vmatprep.subr.bf16.mxu1 %v4136_v0 }
 0x654   : > { %v1374_v14 = vpop.f32.mrb[4].mxu1 }
 0x655   : > { %v1380_v15 = vpack.c.bf16 %v1374_v14, %v1374_v14  ;;  %v2948_v16 = vpop.f32.mrb[5].mxu1  ;;  %v3382_v14 = vld [vmem:[#allocation29 + $0x8] sm:$0xff]  }
 0x656   : > { %v1377_v17 = vpop.f32.mrb[6].mxu1  ;;  %v3384_v16 = vld [vmem:[#allocation29 + $0x18] sm:$0xff]  }
 0x657   : > { %v2949_v18 = vpop.f32.mrb[7].mxu1  ;;  %2967 = vmatmul.mubr.bf16.vlgmr.msra.gmra.mrb[8].mxu0 %v1380_v15  ;;  %v3383_v15 = vld [vmem:[#allocation29 + $0x10] sm:$0xff]   ;;  %v3385_v17 = vld [vmem:[#allocation29 + $0x20] sm:$0xff]  }
 0x658   : > { %3006 = vmatprep.mubr.msk.bf16.mxu0 %vm4138_vm0, %v4136_v0  ;;  %2991 = vmatpush3.bf16.msra.mxu0 %v3365_v41  ;;  %v3386_v18 = vld [vmem:[#allocation29 + $0x28] sm:$0xff]  }
 0x659   : > { %2992 = vmatprep.subr.bf16.mxu0 %v4136_v0 }
 0x65c   : > { %2993 = vmatpush3.bf16.msra.mxu0 %v3366_v42 }
 0x65d   : > { %2994 = vmatprep.subr.bf16.mxu0 %v4136_v0 }
 0x660   : > { %2995 = vmatpush3.bf16.msra.mxu0 %v3367_v43 }
 0x661   : > { %2996 = vmatprep.subr.bf16.mxu0 %v4136_v0 }
 0x664   : > { %2997 = vmatpush3.bf16.msra.mxu0 %v3368_v44 }
 0x665   : > { %2998 = vmatprep.subr.bf16.mxu0 %v4136_v0 }
 0x668   : > { %2999 = vmatpush3.bf16.msra.mxu0 %v3369_v45  ;;  %v3395_v45 = vld [vmem:[%s5164_s14 + $0x30] sm:$0xff]  }
 0x669   : > { %3000 = vmatprep.subr.bf16.mxu0 %v4136_v0 }
 0x66c   : > { %3001 = vmatpush3.bf16.msra.mxu0 %v3370_v46  ;;  %v3396_v46 = vld [vmem:[%s5164_s14 + $0x38] sm:$0xff]  }
 0x66d   : > { %3002 = vmatprep.subr.bf16.mxu0 %v4136_v0 }
 0x670   : > { %3003 = vmatpush3.bf16.msra.mxu0 %v3371_v57  ;;  %v3429_v57 = vld [vmem:[#allocation32 + $0xa4] ss:$16 sps:$4 sm:$0xff]  }
 0x671   : > { %3004 = vmatprep.subr.bf16.mxu0 %v4136_v0 }
 0x674   : > { %3005 = vmatpush3.bf16.msra.mxu0 %v3372_v58  ;;  %v3427_v58 = vld [vmem:[#allocation32 + $0xa0] ss:$16 sps:$4 sm:$0xff]  }
 0x675   : > { %3030 = vmatprep.subr.bf16.mxu0 %v4136_v0 }
 0x72a   : > { %v1486_v20 = vpop.f32.mrb[8].mxu0 }
 0x72b   : > { %v1487_v21 = vadd.f32 %v2757_v19, %v1486_v20  ;;  %v2968_v22 = vpop.f32.mrb[9].mxu0  ;;  %v3387_v19 = vld [vmem:[#allocation29 + $0x30] sm:$0xff]   ;;  %v2777_v20 = vld [vmem:[#allocation24] ss:$0 sm:$0xff] }
 0x72c   : > { %v1489_v23 = vpop.f32.mrb[10].mxu0 }
 0x72d   : > { %v2969_v24 = vpop.f32.mrb[11].mxu0  ;;  %v1492_v25 = vadd.f32 %v1487_v21, %v4848_v27  ;;  %v3361_v27 = vld [vmem:[#allocation20 + $0x20] sm:$0xff]  }
 0x72e   : > { %2979 = vmatpush3.bf16.msra.mxu1 %v3361_v27  ;;  %v3394_v27 = vld [vmem:[%s5164_s14 + $0x28] sm:$0xff]  }
 0x72f   : > { %1493 = vadd.xlane.f32.xlu1 %v1492_v25  ;;  %2980 = vmatprep.subr.bf16.mxu1 %v4136_v0 }
 0x732   : > { %2981 = vmatpush3.bf16.msra.mxu1 %v3362_v38  ;;  %v2786_v38 = vld [vmem:[#allocation27] ss:$0 sm:$0xff] }
 0x733   : > { %2982 = vmatprep.subr.bf16.mxu1 %v4136_v0 }
 0x736   : > { %2983 = vmatpush3.bf16.msra.mxu1 %v3363_v39 }
 0x737   : > { %2984 = vmatprep.subr.bf16.mxu1 %v4136_v0 }
 0x73a   : > { %2985 = vmatpush3.bf16.msra.mxu1 %v3364_v40 }
 0x73b   : > { %3010 = vmatprep.subr.bf16.mxu1 %v4136_v0 }
 0x7bc   : > { %v1494_v29 = vpop.xlane.xlu1 %1493 }
 0x7bd   : > { %v1496_v30 = vmul.f32 0.0078125, %v1494_v29  ;;  %v3388_v29 = vld [vmem:[#allocation29 + $0x38] sm:$0xff]  }
 0x7bf   : > { %v1497_v33 = vsub.f32 %v1492_v25, %v1496_v30  ;;  %v3389_v30 = vld [vmem:[%s5164_s14] sm:$0xff]  }
 0x7c1   : > { %v1498_v35 = vmul.f32 %v1497_v33, %v1497_v33 }
 0x7c3   : > { %1499 = vadd.xlane.f32.xlu1 %v1498_v35  ;;  %v3391_v35 = vld [vmem:[%s5164_s14 + $0x10] sm:$0xff]  }
 0x850   : > { %v1500_v47 = vpop.xlane.xlu1 %1499 }
 0x851   : > { %v1501_v48 = vmul.f32 0.0078125, %v1500_v47  ;;  %v3397_v47 = vld [vmem:[#allocation32] ss:$16 sps:$4 sm:$0xff]  }
 0x853   : > { %v1502_v49 = vadd.f32 1e-05, %v1501_v48  ;;  %v3399_v48 = vld [vmem:[#allocation32 + $0x4] ss:$16 sps:$4 sm:$0xff]  }
 0x855   : > { %3449 = vrsqrt.f32 %v1502_v49  ;;  %v3402_v49 = vld [vmem:[#allocation32 + $0xc] ss:$16 sps:$4 sm:$0xff]  }
 0x85f   : > { %v3450_v50 = vpop.eup %3449 }
 0x860   : > { %v1504_v52 = vmul.f32 %v3450_v50, %v1497_v33  ;;  %v3390_v33 = vld [vmem:[%s5164_s14 + $0x8] sm:$0xff]  }
 0x861   : > { %v3405_v50 = vld [vmem:[#allocation32 + $0x24] ss:$16 sps:$4 sm:$0xff]  }
 0x862   : > { %v1512_v54 = vmul.f32 %v2766_v51, %v1504_v52  ;;  %v3403_v51 = vld [vmem:[#allocation32 + $0x20] ss:$16 sps:$4 sm:$0xff]   ;;  %v3411_v52 = vld [vmem:[#allocation32 + $0x44] ss:$16 sps:$4 sm:$0xff]  }
 0x864   : > { %v4901_v55 = vadd.f32 %v2767_v53, %v1512_v54  ;;  %v3409_v53 = vld [vmem:[#allocation32 + $0x40] ss:$16 sps:$4 sm:$0xff]   ;;  %v3417_v54 = vld [vmem:[#allocation32 + $0x64] ss:$16 sps:$4 sm:$0xff]  }
 0x866   : > { %v1521_v56 = vpack.c.bf16 %v4901_v55, %v4901_v55 }
 0x868   : > { %2987 = vmatmul.mubr.bf16.vlgmr.msra.gmra.mrb[8].mxu1 %v1521_v56  ;;  %v3421_v56 = vld [vmem:[#allocation32 + $0x80] ss:$16 sps:$4 sm:$0xff]  }
 0x869   : > { %3026 = vmatprep.mubr.msk.bf16.mxu1 %vm4138_vm0, %v4136_v0  ;;  %3011 = vmatpush3.bf16.msra.mxu1 %v3373_v59  ;;  %v3435_v59 = vld [vmem:[#allocation32 + $0xc4] ss:$16 sps:$4 sm:$0xff]  }
 0x86a   : > { %3012 = vmatprep.subr.bf16.mxu1 %v4136_v0 }
 0x86d   : > { %3013 = vmatpush3.bf16.msra.mxu1 %v3374_v60  ;;  %v3433_v60 = vld [vmem:[#allocation32 + $0xc0] ss:$16 sps:$4 sm:$0xff]  }
 0x86e   : > { %3014 = vmatprep.subr.bf16.mxu1 %v4136_v0 }
 0x871   : > { %3015 = vmatpush3.bf16.msra.mxu1 %v3375_v61  ;;  %v2795_v61 = vld [vmem:[#allocation30] ss:$0 sm:$0xff] }
 0x872   : > { %3016 = vmatprep.subr.bf16.mxu1 %v4136_v0 }
 0x875   : > { %3017 = vmatpush3.bf16.msra.mxu1 %v3376_v62 }
 0x876   : > { %3018 = vmatprep.subr.bf16.mxu1 %v4136_v0 }
 0x879   : > { %3019 = vmatpush3.bf16.msra.mxu1 %v3377_v63 }
 0x87a   : > { %3020 = vmatprep.subr.bf16.mxu1 %v4136_v0 }
 0x87d   : > { %3021 = vmatpush3.bf16.msra.mxu1 %v3378_v2 }
 0x87e   : > { %3022 = vmatprep.subr.bf16.mxu1 %v4136_v0 }
 0x881   : > { %3023 = vmatpush3.bf16.msra.mxu1 %v3379_v11  ;;  %v3412_v11 = vld [vmem:[#allocation32 + $0x48] ss:$16 sps:$4 sm:$0xff]  }
 0x882   : > { %3024 = vmatprep.subr.bf16.mxu1 %v4136_v0 }
 0x885   : > { %3025 = vmatpush3.bf16.msra.mxu1 %v3380_v12  ;;  %v3420_v12 = vld [vmem:[#allocation32 + $0x6c] ss:$16 sps:$4 sm:$0xff]  }
 0x886   : > { %3050 = vmatprep.subr.bf16.mxu1 %v4136_v0 }
 0x93b   : > { %v1627_v4 = vpop.f32.mrb[8].mxu1 }
 0x93c   : > { %v1628_v5 = vadd.f32 %v2768_v3, %v1627_v4  ;;  %v2988_v6 = vpop.f32.mrb[9].mxu1 }
 0x93d   : > { %v1630_v7 = vpop.f32.mrb[10].mxu1  ;;  %v3400_v6 = vld [vmem:[#allocation32 + $0x8] ss:$16 sps:$4 sm:$0xff]  }
 0x93e   : > { %v1633_v8 = vmax.f32 %v1628_v5, 0.0  ;;  %v2989_v9 = vpop.f32.mrb[11].mxu1 }
 0x93f   : > { %v3406_v9 = vld [vmem:[#allocation32 + $0x28] ss:$16 sps:$4 sm:$0xff]  }
 0x940   : > { %v1634_v10 = vpack.c.bf16 %v1633_v8, %v1633_v8  ;;  %v3408_v8 = vld [vmem:[#allocation32 + $0x2c] ss:$16 sps:$4 sm:$0xff]  }
 0x942   : > { %3007 = vmatmul.mubr.bf16.vlgmr.msra.gmra.mrb[12].mxu0 %v1634_v10  ;;  %v3414_v10 = vld [vmem:[#allocation32 + $0x4c] ss:$16 sps:$4 sm:$0xff]  }
 0x943   : > { %3046 = vmatprep.mubr.msk.bf16.mxu0 %vm4138_vm0, %v4136_v0  ;;  %3031 = vmatpush3.bf16.msra.mxu0 %v3381_v13  ;;  %v3418_v13 = vld [vmem:[#allocation32 + $0x68] ss:$16 sps:$4 sm:$0xff]  }
 0x944   : > { %3032 = vmatprep.subr.bf16.mxu0 %v4136_v0 }
 0x947   : > { %3033 = vmatpush3.bf16.msra.mxu0 %v3382_v14  ;;  %v3426_v14 = vld [vmem:[#allocation32 + $0x8c] ss:$16 sps:$4 sm:$0xff]  }
 0x948   : > { %3034 = vmatprep.subr.bf16.mxu0 %v4136_v0 }
 0x94b   : > { %3035 = vmatpush3.bf16.msra.mxu0 %v3383_v15  ;;  %v3424_v15 = vld [vmem:[#allocation32 + $0x88] ss:$16 sps:$4 sm:$0xff]  }
 0x94c   : > { %3036 = vmatprep.subr.bf16.mxu0 %v4136_v0 }
 0x94f   : > { %3037 = vmatpush3.bf16.msra.mxu0 %v3384_v16  ;;  %v3432_v16 = vld [vmem:[#allocation32 + $0xac] ss:$16 sps:$4 sm:$0xff]  }
 0x950   : > { %3038 = vmatprep.subr.bf16.mxu0 %v4136_v0 }
 0x953   : > { %3039 = vmatpush3.bf16.msra.mxu0 %v3385_v17  ;;  %v3430_v17 = vld [vmem:[#allocation32 + $0xa8] ss:$16 sps:$4 sm:$0xff]  }
 0x954   : > { %3040 = vmatprep.subr.bf16.mxu0 %v4136_v0 }
 0x957   : > { %3041 = vmatpush3.bf16.msra.mxu0 %v3386_v18  ;;  %v3438_v18 = vld [vmem:[#allocation32 + $0xcc] ss:$16 sps:$4 sm:$0xff]  }
 0x958   : > { %3042 = vmatprep.subr.bf16.mxu0 %v4136_v0 }
 0x95b   : > { %3043 = vmatpush3.bf16.msra.mxu0 %v3387_v19  ;;  %v3441_v19 = vld [vmem:[#allocation32 + $0xe4] ss:$16 sps:$4 sm:$0xff]  }
 0x95c   : > { %3044 = vmatprep.subr.bf16.mxu0 %v4136_v0 }
 0x95f   : > { %3045 = vmatpush3.bf16.msra.mxu0 %v3388_v29 }
 0x960   : > { %2302 = vmatprep.subr.bf16.mxu0 %v3399_v48 }
 0xa15   : > { %v1740_v21 = vpop.f32.mrb[12].mxu0 }
 0xa16   : > { %v1741_v22 = vadd.f32 %v2777_v20, %v1740_v21  ;;  %v3008_v23 = vpop.f32.mrb[13].mxu0  ;;  %v3444_v20 = vld [vmem:[#allocation32 + $0xec] ss:$16 sps:$4 sm:$0xff]   ;;  %v3439_v21 = vld [vmem:[#allocation32 + $0xe0] ss:$16 sps:$4 sm:$0xff]  }
 0xa17   : > { %v1743_v24 = vpop.f32.mrb[14].mxu0  ;;  %v2804_v23 = vld [vmem:[%s5165_s29] ss:$0 sm:$0xff]  ;;  %s4139_s29 = smov [#allocation33]  }
 0xa18   : > { %v1746_v25 = vadd.f32 %v1741_v22, %v4901_v55  ;;  %v3009_v26 = vpop.f32.mrb[15].mxu0  ;;  %v3423_v55 = vld [vmem:[#allocation32 + $0x84] ss:$16 sps:$4 sm:$0xff]   ;;  %v3442_v22 = vld [vmem:[#allocation32 + $0xe8] ss:$16 sps:$4 sm:$0xff]   ;;  %s3991_s18 = sshll.u32 %s4139_s29, 4  ;;  %s3992_s18 = int_to_ptr.vmem [resolvable:$false] %s3991_s18 }
 0xa19   : > { %s3993_s22 = scalar_lea.vmem %s3992_s18, 1024  ;;  %p3994_p7 = scmp.lt.s32.totalorder %s4986_s27, %s3992_s18 }
 0xa1a   : > { %v1747_v28 = vpack.c.bf16 %v1746_v25, %v1746_v25  ;;  %p3995_p5 = scmp.lt.s32.totalorder %s3993_s22, %s3987_s1 }
 0xa1c   : > { %3027 = vmatmul.mubr.bf16.vlgmr.msra.gmra.mrb[12].mxu1 %v1747_v28  ;;  %p3996_p2 = por %p3995_p5, %p3994_p7 }
 0xa1d   : > { %3066 = vmatprep.mubr.msk.bf16.mxu1 %vm4138_vm0, %v4136_v0  ;;  %3051 = vmatpush3.bf16.msra.mxu1 %v3389_v30 }
 0xa1e   : > { %3052 = vmatprep.subr.bf16.mxu1 %v4136_v0  ;;  %p3997_p4 = pnand %p3996_p2, %p3990_p0 }
 0xa21   : > { %3053 = vmatpush3.bf16.msra.mxu1 %v3390_v33 }
 0xa22   : > { %3054 = vmatprep.subr.bf16.mxu1 %v4136_v0 }
 0xa25   : > { %3055 = vmatpush3.bf16.msra.mxu1 %v3391_v35  ;;  %v2132_v35 = vsub.s32 2, %v4859_v31 }
 0xa26   : > { %3056 = vmatprep.subr.bf16.mxu1 %v4136_v0 }
 0xa29   : > { %3057 = vmatpush3.bf16.msra.mxu1 %v3392_v36  ;;  %v2120_v36 = vld [vmem:[%s5167_s10] sm:$0xf] }
 0xa2a   : > { %3058 = vmatprep.subr.bf16.mxu1 %v4136_v0 }
 0xa2d   : > { %3059 = vmatpush3.bf16.msra.mxu1 %v3393_v37  ;;  %v2136_v37 = vsub.s32 3, %v4859_v31 }
 0xa2e   : > { %3060 = vmatprep.subr.bf16.mxu1 %v4136_v0 }
 0xa31   : > { %3061 = vmatpush3.bf16.msra.mxu1 %v3394_v27  ;;  %v2125_v27 = vrot.slane %v2120_v36, %v1147_v32 }
 0xa32   : > { %3062 = vmatprep.subr.bf16.mxu1 %v4136_v0 }
 0xa35   : > { %3063 = vmatpush3.bf16.msra.mxu1 %v3395_v45 }
 0xa36   : > { %3064 = vmatprep.subr.bf16.mxu1 %v4136_v0  ;;  %v3415_v0 = vld [vmem:[#allocation32 + $0x60] ss:$16 sps:$4 sm:$0xff]  }
 0xa39   : > { %3065 = vmatpush3.bf16.msra.mxu1 %v3396_v46 }
 0xa3a   : > { %2343 = vmatprep.subr.bf16.mxu1 %v3402_v49 }
 0xaef   : > { %v1853_v39 = vpop.f32.mrb[12].mxu1 }
 0xaf0   : > { %v4953_v40 = vadd.f32 %v2786_v38, %v1853_v39  ;;  %v3028_v41 = vpop.f32.mrb[13].mxu1  ;;  %v2133_v38 = vrot.slane %v2120_v36, %v2132_v35  ;;  %v2129_v39 = vrot.slane %v2120_v36, %v1151_v34 }
 0xaf1   : > { %v1856_v42 = vpop.f32.mrb[14].mxu1 }
 0xaf2   : > { %v1859_v43 = vpack.c.bf16 %v4953_v40, %v4953_v40  ;;  %v3029_v44 = vpop.f32.mrb[15].mxu1 }
 0xaf4   : > { %3047 = vmatmul.mubr.bf16.vlgmr.msra.gmra.mrb[16].mxu0 %v1859_v43 }
 0xaf5   : > { %2334 = vmatprep.mubr.bf16.mxu0 %v4137_v1  ;;  %2303 = vmatpush1.bf16.msra.mxu0 %v3397_v47 }
 0xaf6   : > { %2304 = vmatprep.subr.bf16.mxu0 %v3405_v50 }
 0xaf9   : > { %2305 = vmatpush1.bf16.msra.mxu0 %v3403_v51 }
 0xafa   : > { %2306 = vmatprep.subr.bf16.mxu0 %v3411_v52 }
 0xafd   : > { %2307 = vmatpush1.bf16.msra.mxu0 %v3409_v53 }
 0xafe   : > { %2308 = vmatprep.subr.bf16.mxu0 %v3417_v54 }
 0xb01   : > { %2309 = vmatpush1.bf16.msra.mxu0 %v3415_v0 }
 0xb02   : > { %2310 = vmatprep.subr.bf16.mxu0 %v3423_v55 }
 0xb05   : > { %2311 = vmatpush1.bf16.msra.mxu0 %v3421_v56 }
 0xb06   : > { %2312 = vmatprep.subr.bf16.mxu0 %v3429_v57 }
 0xb09   : > { %2313 = vmatpush1.bf16.msra.mxu0 %v3427_v58 }
 0xb0a   : > { %2314 = vmatprep.subr.bf16.mxu0 %v3435_v59 }
 0xb0d   : > { %2315 = vmatpush1.bf16.msra.mxu0 %v3433_v60 }
 0xb0e   : > { %2316 = vmatprep.subr.bf16.mxu0 %v3441_v19 }
 0xb11   : > { %2317 = vmatpush1.bf16.msra.mxu0 %v3439_v21 }
 0xbc7   : > { %v1965_v62 = vpop.f32.mrb[16].mxu0 }
 0xbc8   : > { %v1966_v63 = vadd.f32 %v2795_v61, %v1965_v62  ;;  %v3048_v2 = vpop.f32.mrb[17].mxu0 }
 0xbc9   : > { %v1968_v3 = vpop.f32.mrb[18].mxu0 }
 0xbca   : > { %v1971_v4 = vmax.f32 %v1966_v63, 0.0  ;;  %v3049_v5 = vpop.f32.mrb[19].mxu0 }
 0xbcc   : > { %v1972_v7 = vpack.c.bf16 %v1971_v4, %v1971_v4 }
 0xbce   : > { %3067 = vmatmul.mubr.bf16.vlgmr.msra.gmra.mrb[16].mxu1 %v1972_v7 }
 0xbcf   : > { %2344 = vmatpush1.bf16.msra.mxu1 %v3400_v6  ;;  %2375 = vmatprep.mubr.bf16.mxu1 %v4137_v1  ;;  %v3436_v1 = vld [vmem:[#allocation32 + $0xc8] ss:$16 sps:$4 sm:$0xff]  }
 0xbd0   : > { %2345 = vmatprep.subr.bf16.mxu1 %v3408_v8 }
 0xbd3   : > { %2346 = vmatpush1.bf16.msra.mxu1 %v3406_v9 }
 0xbd4   : > { %2347 = vmatprep.subr.bf16.mxu1 %v3414_v10 }
 0xbd7   : > { %2348 = vmatpush1.bf16.msra.mxu1 %v3412_v11 }
 0xbd8   : > { %2349 = vmatprep.subr.bf16.mxu1 %v3420_v12 }
 0xbdb   : > { %2350 = vmatpush1.bf16.msra.mxu1 %v3418_v13 }
 0xbdc   : > { %2351 = vmatprep.subr.bf16.mxu1 %v3426_v14 }
 0xbdf   : > { %2352 = vmatpush1.bf16.msra.mxu1 %v3424_v15 }
 0xbe0   : > { %2353 = vmatprep.subr.bf16.mxu1 %v3432_v16 }
 0xbe3   : > { %2354 = vmatpush1.bf16.msra.mxu1 %v3430_v17 }
 0xbe4   : > { %2355 = vmatprep.subr.bf16.mxu1 %v3438_v18 }
 0xbe7   : > { %2356 = vmatpush1.bf16.msra.mxu1 %v3436_v1 }
 0xbe8   : > { %2357 = vmatprep.subr.bf16.mxu1 %v3444_v20 }
 0xbeb   : > { %2358 = vmatpush1.bf16.msra.mxu1 %v3442_v22 }
 0xca1   : > { %v2078_v24 = vpop.f32.mrb[16].mxu1 }
 0xca2   : > { %v2079_v25 = vadd.f32 %v2804_v23, %v2078_v24  ;;  %v3068_v26 = vpop.f32.mrb[17].mxu1 }
 0xca3   : > { %v2081_v28 = vpop.f32.mrb[18].mxu1 }
 0xca4   : > { %v2084_v29 = vadd.f32 %v2079_v25, %v4953_v40  ;;  %v3069_v30 = vpop.f32.mrb[19].mxu1  ;;  %v2137_v40 = vrot.slane %v2120_v36, %v2136_v37 }
 0xca6   : > { %v2087_v33 = vpack.c.bf16 %v2084_v29, %v2084_v29 }
 0xca8   : > { %2335 = vmatmul.mubr.bf16.vlgmr.msra.gmra.mrb[20].mxu0 %v2087_v33  ;;  %2376 = vmatmul.mubr.bf16.vlgmr.msra.gmra.mrb[20].mxu1 %v2087_v33 }
 0xd7b   : > { %v2336_v41 = vpop.f32.mrb[20].mxu0  ;;  %v2377_v42 = vpop.f32.mrb[20].mxu1 }
 0xd7c   : > { %v2337_v43 = vadd.f32 %v2336_v41, %v2125_v27  ;;  %v2378_v44 = vadd.f32 %v2377_v42, %v2133_v38  ;;  %v2338_v45 = vpop.f32.mrb[21].mxu0  ;;  %v2379_v46 = vpop.f32.mrb[21].mxu1 }
 0xd7d   : > { %v2339_v47 = vadd.f32 %v2338_v45, %v2129_v39  ;;  %v2380_v48 = vadd.f32 %v2379_v46, %v2137_v40  ;;  %v2340_v49 = vpop.f32.mrb[22].mxu0  ;;  %v2381_v32 = vpop.f32.mrb[22].mxu1 }
 0xd7e   : > { %2384 = vst [vmem:[%s999_s4] sm:$0xff] %v2337_v43  ;;  %2386 = vst [vmem:[%s999_s4 + $0x10] sm:$0xff] %v2378_v44  ;;  %v2341_v31 = vpop.f32.mrb[23].mxu0  ;;  %v2382_v34 = vpop.f32.mrb[23].mxu1 }
 0xd7f   : > { %2385 = vst [vmem:[%s999_s4 + $0x8] sm:$0xff] %v2339_v47  ;;  %2387 = vst [vmem:[%s999_s4 + $0x18] sm:$0xff] %v2380_v48 }
 0xd80   : > { %4000 = shalt.err (!%p3997_p4)
}
 0xd81   : > { %s4001_s6 = scalar_lea.hbm %s4984_s30, 512  ;;  %s4005_s10 = scalar_lea.hbm %s5168_s8, 1024 }
 0xd82   : > { %p4002_p11 = scmp.ne.s32.totalorder %s4984_s30, %s4001_s6  ;;  %p4006_p1 = scmp.lt.u32.totalorder %s4984_s30, %s5168_s8 }
 0xd83   : > { %p4007_p9 = scmp.lt.u32.totalorder %s4005_s10, %s4001_s6  ;;  %p4009_p3 = scmp.lt.u32.totalorder %s4001_s6, %s4984_s30 }
 0xd84   : > { %p4003_p6 = pnand %p4002_p11, %p5169_p12 }
 0xd85   : > { %p4008_p8 = por %p4007_p9, %p4006_p1 }
 0xd86   : > { %p4004_p10 = pneg %p4003_p6 }
 0xd87   : > { %p4010_p13 = por %p4009_p3, %p4008_p8 }
 0xd89   : > { %p4011_p0 = pnand %p4010_p13, %p4004_p10 }
 0xd8b   : > { %4014 = shalt.err (!%p4011_p0)
}
 0xd8c   : > { %3142 = dma.vmem_to_hbm [thread:$0]  (%p5169_p12), %s4986_s27, 512, %s4984_s30, %s2389_s26  }
 0xd8d PF: > { %s5170_s5 = sld [smem:[#allocation46_spill]]  ;;  %p5171_p7 = scmp.ne.s32.totalorder %s5136_s19, 0 }
 0xd8e   : > { %p5172_p5 = scmp.ge.s32.totalorder %s4109_s0, 2 }
 0xd90   : > { %p3204_p2 = pnand %p5172_p5, %p5171_p7 }
 0xd93   : > { %s2417_s13 = sand.u32 1, %s5170_s5  }
 0xd94   : > { %s2418_s1 = scalar_lea.sflag [#allocation5], %s2417_s13 }
 0xd95   : > { %4084 = dma.done.wait (!%p3204_p2), %s2418_s1, 512  }
 0xd96   : > { %4086 = vsyncadd (!%p3204_p2), %s2418_s1, 4294966784  ;;  %s49_s0 = sadd.s32 1, %s4109_s0   ;;  %s5173_s29 = sld [smem:[#allocation47_spill]] }
 0xd97   : > { %p46_p4 = scmp.ge.s32.totalorder %s49_s0, 4   ;;  %s5174_s28 = sld [smem:[#allocation48_spill]] }
 0xd98   : > { %s5175_s30 = sld [smem:[#allocation50_spill]]  ;;  %s5176_s7 = smov %s5181_s3 }
 0xd99   : > { %s5179_s4 = smov %s5176_s7  ;;  %48 = sbr.rel (!%p46_p4) target bundleno = 36 (0x24), region = 242 }
 0xd9c   : > { %s5177_s3 = smov %s5173_s29  ;;  %s5178_s29 = smov %s4703_s9 }
 0xda0   :  { %2423 = vsyncpa [#allocation4], 1 }
 0xda1   :  { %2425 = vsyncpa [#allocation4 + $0x1], 1 }
 0xda2   :  { %2426 = vsyncpa [#allocation7], 1 }
 0xda3   :  { %2428 = vsyncpa [#allocation7 + $0x1], 1 }
 0xda4   :  { %2429 = vsyncpa [#allocation10], 1 }
 0xda5   :  { %2430 = vsyncpa [#allocation13], 1 }
 0xda6   :  { %2431 = vsyncpa [#allocation16], 1 }
 0xda7   :  { %2432 = vsyncpa [#allocation19], 1 }
 0xda8   :  { %2433 = vsyncpa [#allocation22], 1 }
 0xda9   :  { %2434 = vsyncpa [#allocation25], 1 }
 0xdaa   :  { %2435 = vsyncpa [#allocation28], 1 }
 0xdab   :  { %2436 = vsyncpa [#allocation31], 1 }
 0xdac   :  { %2437 = vsyncpa [#allocation5], 1 }
 0xdad   :  { %2439 = vsyncpa [#allocation5 + $0x1], 1 }

</bundles_post_ra>
